<compile_context>
chip_gen: v5e
topology: v5e:2x2
jax: 0.10.0
libtpu: 0.0.40
codegen_flags: <defaults>
</compile_context>

<pallas_src>
import math
import numpy as np
import jax
import jax.numpy as jnp
from jax import lax
from jax.experimental import pallas as pl
from jax.experimental.pallas import tpu as pltpu


def _round_up(x, m):
    return ((x + m - 1) // m) * m


_PAD_MODE = {'replicate': 'edge', 'constant': 'constant',
             'reflect': 'reflect', 'circular': 'wrap'}


def _pad_or_crop(x, pads_dhw, mode):
    """Pad (or crop, for negative pads — F.pad semantics) the D/H/W axes of a
    channels-last [N, D, H, W, C] array."""
    pos = tuple((max(lo, 0), max(hi, 0)) for lo, hi in pads_dhw)
    x = jnp.pad(x, ((0, 0),) + pos + ((0, 0),), mode=mode)
    idx = [slice(None)]
    for lo, hi in pads_dhw:
        start = -lo if lo < 0 else 0
        stop = hi if hi < 0 else None
        idx.append(slice(start, stop))
    idx.append(slice(None))
    return x[tuple(idx)]


# ---------------------------------------------------------------------------
# Pallas kernel: one (n, do) output plane, reduced over depth taps kd on the
# grid; Kh*Kw in-plane taps unrolled inside, accumulating in f32 VMEM scratch.
# ---------------------------------------------------------------------------
def _make_conv_kernel(Kd, Kh, Kw, sh, sw, Hq, Wq, Ho, Wo_pad):
    HW = Ho * Wo_pad

    def kernel(x_ref, w_ref, b_ref, o_ref, acc_ref):
        kd = pl.program_id(2)

        @pl.when(kd == 0)
        def _init():
            acc_ref[...] = jnp.zeros_like(acc_ref)

        partial = None
        for kh in range(Kh):
            qh, rh = kh // sh, kh % sh
            h0 = rh * Hq + qh
            for kw in range(Kw):
                qw, rw = kw // sw, kw % sw
                w0 = rw * Wq + qw
                # Contiguous static slice thanks to the phase rearrangement.
                tap = x_ref[0, 0, h0:h0 + Ho, w0:w0 + Wo_pad, :]   # [Ho,Wo_pad,Cin] bf16
                tap = tap.reshape(HW, tap.shape[-1])               # layout-preserving
                wt = w_ref[kd, kh * Kw + kw]                       # [Cin, Cout_pad] bf16
                d = jnp.dot(tap, wt, preferred_element_type=jnp.float32)
                partial = d if partial is None else partial + d
        acc_ref[...] += partial

        @pl.when(kd == Kd - 1)
        def _finish():
            o_ref[0, 0] = (acc_ref[...] + b_ref[...]).astype(o_ref.dtype)

    return kernel


# ---------------------------------------------------------------------------
# Module port.
# ---------------------------------------------------------------------------
class SamePadConv3dPallas:
    def __init__(self, in_channels, out_channels, kernel_size, stride=1,
                 bias=True, padding_type='replicate', *, key):
        if isinstance(kernel_size, int):
            kernel_size = (kernel_size,) * 3
        if isinstance(stride, int):
            stride = (stride,) * 3
        self.in_channels = in_channels
        self.out_channels = out_channels
        self.kernel_size = tuple(kernel_size)
        self.stride = tuple(stride)
        self.padding_type = padding_type

        # Same-pad amounts per (D,H,W): total = k - s, left = ceil, right = floor
        # (identical arithmetic to the PyTorch module; negative => crop).
        total_pad = tuple(k - s for k, s in zip(self.kernel_size, self.stride))
        self.pad_dhw = tuple((p // 2 + p % 2, p // 2) for p in total_pad)

        # Deterministic init with nn.Conv3d's default bound / shapes.
        fan_in = in_channels * int(np.prod(self.kernel_size))
        bound = 1.0 / math.sqrt(fan_in)
        kweight, kbias = jax.random.split(key)
        self.weight = jax.random.uniform(
            kweight, (out_channels, in_channels) + self.kernel_size,
            jnp.float32, -bound, bound)                  # [Cout, Cin, Kd, Kh, Kw]
        if bias:
            self.bias = jax.random.uniform(kbias, (out_channels,),
                                           jnp.float32, -bound, bound)
        else:
            self.bias = jnp.zeros((out_channels,), jnp.float32)

        # Pre-pack weight/bias once: lane-dense Cout (pad to 128), per-tap
        # [Cin, Cout_pad] layout, bf16 MXU operands (bias stays f32).
        Kd, Kh, Kw = self.kernel_size
        self.cout_pad = _round_up(out_channels, 128)
        w = jnp.transpose(self.weight, (2, 3, 4, 1, 0))  # [Kd,Kh,Kw,Cin,Cout]
        w = jnp.pad(w, ((0, 0),) * 4 + ((0, self.cout_pad - out_channels),))
        self._w_packed = w.reshape(Kd, Kh * Kw, in_channels,
                                   self.cout_pad).astype(jnp.bfloat16)
        self._b_packed = jnp.pad(self.bias,
                                 (0, self.cout_pad - out_channels)).reshape(1, self.cout_pad)

        self._forward = jax.jit(self._forward_impl)

    def __call__(self, x):
        return self._forward(x)

    def _forward_impl(self, x):
        # x: [N, Cin, D, H, W]  (NCDHW, matching PyTorch).
        N, Cin, D, H, W = x.shape
        Kd, Kh, Kw = self.kernel_size
        sd, sh, sw = self.stride
        mode = _PAD_MODE.get(self.padding_type, self.padding_type)

        # ---- glue: channels-last + same-pad (handles negative pads = crop) ----
        xt = jnp.transpose(x, (0, 2, 3, 4, 1))           # [N, D, H, W, Cin]
        xt = _pad_or_crop(xt, self.pad_dhw, mode)
        Dp, Hp, Wp = xt.shape[1:4]
        Do = (Dp - Kd) // sd + 1
        Ho = (Hp - Kh) // sh + 1
        Wo = (Wp - Kw) // sw + 1

        # ---- phase rearrangement: strided taps -> contiguous slices ----------
        # Pad the W tile to a multiple of 8 so the in-kernel reshape keeps the
        # sublane layout; extra rows/cols read edge values and are sliced off.
        Wo_pad = _round_up(Wo, 8)
        Hq = Ho + (Kh - 1) // sh
        Wq = Wo_pad + (Kw - 1) // sw
        xt = jnp.pad(xt, ((0, 0), (0, 0),
                          (0, max(0, sh * Hq - Hp)),
                          (0, max(0, sw * Wq - Wp)), (0, 0)), mode='edge')
        xt = xt[:, :, :sh * Hq, :sw * Wq, :]
        # original h = i*sh + rh  ->  rearranged rh*Hq + i  (same for W)
        xr = xt.reshape(N, Dp, Hq, sh, Wq, sw, Cin)
        xr = jnp.transpose(xr, (0, 1, 3, 2, 5, 4, 6))
        xr = xr.reshape(N, Dp, sh * Hq, sw * Wq, Cin).astype(jnp.bfloat16)

        HW = Ho * Wo_pad
        Cout = self.out_channels
        Cout_pad = self.cout_pad
        out_dtype = x.dtype
        out_isize = jnp.dtype(out_dtype).itemsize

        kernel = _make_conv_kernel(Kd, Kh, Kw, sh, sw, Hq, Wq, Ho, Wo_pad)

        # VMEM budget + advisory cost (all static Python ints).
        x_blk = sh * Hq * sw * Wq * Cin * 2
        o_blk = HW * Cout_pad * out_isize
        w_bytes = int(self._w_packed.size) * 2
        acc_bytes = HW * Cout_pad * 4
        need = 2 * (x_blk + o_blk) + 2 * (w_bytes + Cout_pad * 4) + acc_bytes
        vmem_limit = int(min(max(2 * need, 8 * 1024 * 1024), 64 * 1024 * 1024))
        flops = 2 * N * Do * Ho * Wo * (Cin * Kd * Kh * Kw) * Cout_pad
        bytes_accessed = int(xr.size) * 2 * Kd + w_bytes + N * Do * o_blk

        out = pl.pallas_call(
            kernel,
            out_shape=jax.ShapeDtypeStruct((N, Do, HW, Cout_pad), out_dtype),
            grid=(N, Do, Kd),
            in_specs=[
                # One rearranged (H,W) plane of the padded input per (n, do, kd).
                pl.BlockSpec((1, 1, sh * Hq, sw * Wq, Cin),
                             lambda n, do, kd: (n, do * sd + kd, 0, 0, 0)),
                # Full packed weight, resident in VMEM across the whole grid.
                pl.BlockSpec(self._w_packed.shape,
                             lambda n, do, kd: (0, 0, 0, 0)),
                # Bias row (f32, lane-dense Cout_pad).
                pl.BlockSpec((1, Cout_pad), lambda n, do, kd: (0, 0)),
            ],
            out_specs=pl.BlockSpec((1, 1, HW, Cout_pad),
                                   lambda n, do, kd: (n, do, 0, 0)),
            scratch_shapes=[pltpu.VMEM((HW, Cout_pad), jnp.float32)],
            compiler_params=pltpu.CompilerParams(
                dimension_semantics=("parallel", "parallel", "arbitrary"),
                vmem_limit_bytes=vmem_limit),
            cost_estimate=pl.CostEstimate(
                flops=flops, transcendentals=0, bytes_accessed=bytes_accessed),
        )(xr, self._w_packed, self._b_packed)

        # [N, Do, Ho*Wo_pad, Cout_pad] -> [N, Cout, Do, Ho, Wo]
        out = out.reshape(N, Do, Ho, Wo_pad, Cout_pad)[:, :, :, :Wo, :Cout]
        return jnp.transpose(out, (0, 4, 1, 2, 3))


# ---------------------------------------------------------------------------
# Pure-JAX f32 reference (replicate pad + VALID conv), for correctness check.
# ---------------------------------------------------------------------------
def _reference(mod, x):
    mode = _PAD_MODE.get(mod.padding_type, mod.padding_type)
    xp = jnp.pad(x, ((0, 0), (0, 0)) + mod.pad_dhw, mode=mode)
    y = lax.conv_general_dilated(
        xp, mod.weight, window_strides=mod.stride, padding='VALID',
        dimension_numbers=('NCDHW', 'OIDHW', 'NCDHW'),
        precision=lax.Precision.HIGHEST)
    return y + mod.bias.reshape(1, -1, 1, 1, 1)


if __name__ == "__main__":
    key = jax.random.PRNGKey(0)
    kx, kp1, kp2 = jax.random.split(key, 3)

    # Small shapes consistent with the module: N=2, Cin=4, D=H=W=8, Cout=8.
    x = jax.random.normal(kx, (2, 4, 8, 8, 8), jnp.float32)

    # Config 1: kernel 3, stride 1 (symmetric replicate pad).
    conv1 = SamePadConv3dPallas(4, 8, kernel_size=3, stride=1, key=kp1)
    y1 = jax.block_until_ready(conv1(x))
    r1 = jax.block_until_ready(_reference(conv1, x))

    # Config 2: kernel 3, stride 2 (asymmetric pad, downsampling).
    conv2 = SamePadConv3dPallas(4, 8, kernel_size=3, stride=2, key=kp2)
    y2 = jax.block_until_ready(conv2(x))
    r2 = jax.block_until_ready(_reference(conv2, x))

    assert y1.shape == (2, 8, 8, 8, 8), y1.shape
    assert y2.shape == (2, 8, 4, 4, 4), y2.shape
    # bf16 MXU operands (f32 accumulation) vs. f32 reference -> bf16-level tol.
    np.testing.assert_allclose(np.asarray(y1), np.asarray(r1), atol=5e-2, rtol=5e-2)
    np.testing.assert_allclose(np.asarray(y2), np.asarray(r2), atol=5e-2, rtol=5e-2)

    print("KERNEL_OK")
</pallas_src>

<mosaic_0001>
module attributes {stable_mosaic.version = 11 : i64} {
  func.func @kernel(%arg0: i32, %arg1: i32, %arg2: i32, %arg3: memref<1x1x10x10x4xbf16, #tpu.memory_space<vmem>>, %arg4: memref<3x9x4x128xbf16, #tpu.memory_space<vmem>>, %arg5: memref<1x128xf32, #tpu.memory_space<vmem>>, %arg6: memref<1x1x64x128xf32, #tpu.memory_space<vmem>>, %arg7: memref<64x128xf32, #tpu.memory_space<vmem>>) attributes {dimension_semantics = [#tpu.dimension_semantics<parallel>, #tpu.dimension_semantics<parallel>, #tpu.dimension_semantics<arbitrary>], iteration_bounds = array<i64: 2, 8, 3>, scalar_prefetch = 0 : i64, scratch_operands = 1 : i64, tpu.core_type = #tpu.core_type<tc>, window_params = [{transform_indices = @transform_0, window_bounds = array<i64: 1, 1, 10, 10, 4>}, {pipeline_mode = #tpu.pipeline_mode<synchronous>, transform_indices = @transform_1, window_bounds = array<i64: 3, 9, 4, 128>}, {pipeline_mode = #tpu.pipeline_mode<synchronous>, transform_indices = @transform_2, window_bounds = array<i64: 1, 128>}, {transform_indices = @transform_3, window_bounds = array<i64: 1, 1, 64, 128>}]} {
    %c0_i32 = arith.constant 0 : i32
    %0 = arith.cmpi eq, %arg2, %c0_i32 : i32
    %1 = arith.extui %0 : i1 to i32
    %c0_i32_0 = arith.constant 0 : i32
    %2 = arith.cmpi ne, %1, %c0_i32_0 : i32
    scf.if %2 {
      %cst_77 = arith.constant 0.000000e+00 : f32
      %80 = vector.broadcast %cst_77 : f32 to vector<64x128xf32>
      %c0_78 = arith.constant 0 : index
      %c0_79 = arith.constant 0 : index
      %81 = vector.load %arg7[%c0_78, %c0_79] : memref<64x128xf32, #tpu.memory_space<vmem>>, vector<64x128xf32>
      tpu.vector_store %arg7[%c0_78, %c0_79], %80 {strides = array<i32>} : memref<64x128xf32, #tpu.memory_space<vmem>>, vector<64x128xf32>,
    } else {
    }
    %c0 = arith.constant 0 : index
    %c0_1 = arith.constant 0 : index
    %c0_2 = arith.constant 0 : index
    %c0_3 = arith.constant 0 : index
    %c0_4 = arith.constant 0 : index
    %3 = vector.load %arg3[%c0, %c0_1, %c0_2, %c0_3, %c0_4] : memref<1x1x10x10x4xbf16, #tpu.memory_space<vmem>>, vector<1x1x8x8x4xbf16>
    %4 = vector.shape_cast %3 : vector<1x1x8x8x4xbf16> to vector<8x8x4xbf16>
    %5 = vector.shape_cast %4 : vector<8x8x4xbf16> to vector<64x4xbf16>
    %6 = arith.index_cast %arg2 : i32 to index
    %c0_5 = arith.constant 0 : index
    %c0_6 = arith.constant 0 : index
    %c0_7 = arith.constant 0 : index
    %7 = vector.load %arg4[%6, %c0_5, %c0_6, %c0_7] : memref<3x9x4x128xbf16, #tpu.memory_space<vmem>>, vector<1x1x4x128xbf16>
    %8 = vector.shape_cast %7 : vector<1x1x4x128xbf16> to vector<4x128xbf16>
    %cst = arith.constant dense<0.000000e+00> : vector<64x128xf32>
    %9 = tpu.matmul %5, %8, %cst {dimension_numbers = #tpu.dot_dimension_numbers<[1], [0], [0], [1], [0, 0, 1, 1], [], []>} : vector<64x4xbf16>, vector<4x128xbf16>, vector<64x128xf32> -> vector<64x128xf32>
    %c0_8 = arith.constant 0 : index
    %c0_9 = arith.constant 0 : index
    %c0_10 = arith.constant 0 : index
    %c1 = arith.constant 1 : index
    %c0_11 = arith.constant 0 : index
    %10 = vector.load %arg3[%c0_8, %c0_9, %c0_10, %c1, %c0_11] : memref<1x1x10x10x4xbf16, #tpu.memory_space<vmem>>, vector<1x1x8x8x4xbf16>
    %11 = vector.shape_cast %10 : vector<1x1x8x8x4xbf16> to vector<8x8x4xbf16>
    %12 = vector.shape_cast %11 : vector<8x8x4xbf16> to vector<64x4xbf16>
    %13 = arith.index_cast %arg2 : i32 to index
    %c1_12 = arith.constant 1 : index
    %c0_13 = arith.constant 0 : index
    %c0_14 = arith.constant 0 : index
    %14 = vector.load %arg4[%13, %c1_12, %c0_13, %c0_14] : memref<3x9x4x128xbf16, #tpu.memory_space<vmem>>, vector<1x1x4x128xbf16>
    %15 = vector.shape_cast %14 : vector<1x1x4x128xbf16> to vector<4x128xbf16>
    %cst_15 = arith.constant dense<0.000000e+00> : vector<64x128xf32>
    %16 = tpu.matmul %12, %15, %cst_15 {dimension_numbers = #tpu.dot_dimension_numbers<[1], [0], [0], [1], [0, 0, 1, 1], [], []>} : vector<64x4xbf16>, vector<4x128xbf16>, vector<64x128xf32> -> vector<64x128xf32>
    %17 = arith.addf %9, %16 : vector<64x128xf32>
    %c0_16 = arith.constant 0 : index
    %c0_17 = arith.constant 0 : index
    %c0_18 = arith.constant 0 : index
    %c2 = arith.constant 2 : index
    %c0_19 = arith.constant 0 : index
    %18 = vector.load %arg3[%c0_16, %c0_17, %c0_18, %c2, %c0_19] : memref<1x1x10x10x4xbf16, #tpu.memory_space<vmem>>, vector<1x1x8x8x4xbf16>
    %19 = vector.shape_cast %18 : vector<1x1x8x8x4xbf16> to vector<8x8x4xbf16>
    %20 = vector.shape_cast %19 : vector<8x8x4xbf16> to vector<64x4xbf16>
    %21 = arith.index_cast %arg2 : i32 to index
    %c2_20 = arith.constant 2 : index
    %c0_21 = arith.constant 0 : index
    %c0_22 = arith.constant 0 : index
    %22 = vector.load %arg4[%21, %c2_20, %c0_21, %c0_22] : memref<3x9x4x128xbf16, #tpu.memory_space<vmem>>, vector<1x1x4x128xbf16>
    %23 = vector.shape_cast %22 : vector<1x1x4x128xbf16> to vector<4x128xbf16>
    %cst_23 = arith.constant dense<0.000000e+00> : vector<64x128xf32>
    %24 = tpu.matmul %20, %23, %cst_23 {dimension_numbers = #tpu.dot_dimension_numbers<[1], [0], [0], [1], [0, 0, 1, 1], [], []>} : vector<64x4xbf16>, vector<4x128xbf16>, vector<64x128xf32> -> vector<64x128xf32>
    %25 = arith.addf %17, %24 : vector<64x128xf32>
    %c0_24 = arith.constant 0 : index
    %c0_25 = arith.constant 0 : index
    %c1_26 = arith.constant 1 : index
    %c0_27 = arith.constant 0 : index
    %c0_28 = arith.constant 0 : index
    %26 = vector.load %arg3[%c0_24, %c0_25, %c1_26, %c0_27, %c0_28] : memref<1x1x10x10x4xbf16, #tpu.memory_space<vmem>>, vector<1x1x8x8x4xbf16>
    %27 = vector.shape_cast %26 : vector<1x1x8x8x4xbf16> to vector<8x8x4xbf16>
    %28 = vector.shape_cast %27 : vector<8x8x4xbf16> to vector<64x4xbf16>
    %29 = arith.index_cast %arg2 : i32 to index
    %c3 = arith.constant 3 : index
    %c0_29 = arith.constant 0 : index
    %c0_30 = arith.constant 0 : index
    %30 = vector.load %arg4[%29, %c3, %c0_29, %c0_30] : memref<3x9x4x128xbf16, #tpu.memory_space<vmem>>, vector<1x1x4x128xbf16>
    %31 = vector.shape_cast %30 : vector<1x1x4x128xbf16> to vector<4x128xbf16>
    %cst_31 = arith.constant dense<0.000000e+00> : vector<64x128xf32>
    %32 = tpu.matmul %28, %31, %cst_31 {dimension_numbers = #tpu.dot_dimension_numbers<[1], [0], [0], [1], [0, 0, 1, 1], [], []>} : vector<64x4xbf16>, vector<4x128xbf16>, vector<64x128xf32> -> vector<64x128xf32>
    %33 = arith.addf %25, %32 : vector<64x128xf32>
    %c0_32 = arith.constant 0 : index
    %c0_33 = arith.constant 0 : index
    %c1_34 = arith.constant 1 : index
    %c1_35 = arith.constant 1 : index
    %c0_36 = arith.constant 0 : index
    %34 = vector.load %arg3[%c0_32, %c0_33, %c1_34, %c1_35, %c0_36] : memref<1x1x10x10x4xbf16, #tpu.memory_space<vmem>>, vector<1x1x8x8x4xbf16>
    %35 = vector.shape_cast %34 : vector<1x1x8x8x4xbf16> to vector<8x8x4xbf16>
    %36 = vector.shape_cast %35 : vector<8x8x4xbf16> to vector<64x4xbf16>
    %37 = arith.index_cast %arg2 : i32 to index
    %c4 = arith.constant 4 : index
    %c0_37 = arith.constant 0 : index
    %c0_38 = arith.constant 0 : index
    %38 = vector.load %arg4[%37, %c4, %c0_37, %c0_38] : memref<3x9x4x128xbf16, #tpu.memory_space<vmem>>, vector<1x1x4x128xbf16>
    %39 = vector.shape_cast %38 : vector<1x1x4x128xbf16> to vector<4x128xbf16>
    %cst_39 = arith.constant dense<0.000000e+00> : vector<64x128xf32>
    %40 = tpu.matmul %36, %39, %cst_39 {dimension_numbers = #tpu.dot_dimension_numbers<[1], [0], [0], [1], [0, 0, 1, 1], [], []>} : vector<64x4xbf16>, vector<4x128xbf16>, vector<64x128xf32> -> vector<64x128xf32>
    %41 = arith.addf %33, %40 : vector<64x128xf32>
    %c0_40 = arith.constant 0 : index
    %c0_41 = arith.constant 0 : index
    %c1_42 = arith.constant 1 : index
    %c2_43 = arith.constant 2 : index
    %c0_44 = arith.constant 0 : index
    %42 = vector.load %arg3[%c0_40, %c0_41, %c1_42, %c2_43, %c0_44] : memref<1x1x10x10x4xbf16, #tpu.memory_space<vmem>>, vector<1x1x8x8x4xbf16>
    %43 = vector.shape_cast %42 : vector<1x1x8x8x4xbf16> to vector<8x8x4xbf16>
    %44 = vector.shape_cast %43 : vector<8x8x4xbf16> to vector<64x4xbf16>
    %45 = arith.index_cast %arg2 : i32 to index
    %c5 = arith.constant 5 : index
    %c0_45 = arith.constant 0 : index
    %c0_46 = arith.constant 0 : index
    %46 = vector.load %arg4[%45, %c5, %c0_45, %c0_46] : memref<3x9x4x128xbf16, #tpu.memory_space<vmem>>, vector<1x1x4x128xbf16>
    %47 = vector.shape_cast %46 : vector<1x1x4x128xbf16> to vector<4x128xbf16>
    %cst_47 = arith.constant dense<0.000000e+00> : vector<64x128xf32>
    %48 = tpu.matmul %44, %47, %cst_47 {dimension_numbers = #tpu.dot_dimension_numbers<[1], [0], [0], [1], [0, 0, 1, 1], [], []>} : vector<64x4xbf16>, vector<4x128xbf16>, vector<64x128xf32> -> vector<64x128xf32>
    %49 = arith.addf %41, %48 : vector<64x128xf32>
    %c0_48 = arith.constant 0 : index
    %c0_49 = arith.constant 0 : index
    %c2_50 = arith.constant 2 : index
    %c0_51 = arith.constant 0 : index
    %c0_52 = arith.constant 0 : index
    %50 = vector.load %arg3[%c0_48, %c0_49, %c2_50, %c0_51, %c0_52] : memref<1x1x10x10x4xbf16, #tpu.memory_space<vmem>>, vector<1x1x8x8x4xbf16>
    %51 = vector.shape_cast %50 : vector<1x1x8x8x4xbf16> to vector<8x8x4xbf16>
    %52 = vector.shape_cast %51 : vector<8x8x4xbf16> to vector<64x4xbf16>
    %53 = arith.index_cast %arg2 : i32 to index
    %c6 = arith.constant 6 : index
    %c0_53 = arith.constant 0 : index
    %c0_54 = arith.constant 0 : index
    %54 = vector.load %arg4[%53, %c6, %c0_53, %c0_54] : memref<3x9x4x128xbf16, #tpu.memory_space<vmem>>, vector<1x1x4x128xbf16>
    %55 = vector.shape_cast %54 : vector<1x1x4x128xbf16> to vector<4x128xbf16>
    %cst_55 = arith.constant dense<0.000000e+00> : vector<64x128xf32>
    %56 = tpu.matmul %52, %55, %cst_55 {dimension_numbers = #tpu.dot_dimension_numbers<[1], [0], [0], [1], [0, 0, 1, 1], [], []>} : vector<64x4xbf16>, vector<4x128xbf16>, vector<64x128xf32> -> vector<64x128xf32>
    %57 = arith.addf %49, %56 : vector<64x128xf32>
    %c0_56 = arith.constant 0 : index
    %c0_57 = arith.constant 0 : index
    %c2_58 = arith.constant 2 : index
    %c1_59 = arith.constant 1 : index
    %c0_60 = arith.constant 0 : index
    %58 = vector.load %arg3[%c0_56, %c0_57, %c2_58, %c1_59, %c0_60] : memref<1x1x10x10x4xbf16, #tpu.memory_space<vmem>>, vector<1x1x8x8x4xbf16>
    %59 = vector.shape_cast %58 : vector<1x1x8x8x4xbf16> to vector<8x8x4xbf16>
    %60 = vector.shape_cast %59 : vector<8x8x4xbf16> to vector<64x4xbf16>
    %61 = arith.index_cast %arg2 : i32 to index
    %c7 = arith.constant 7 : index
    %c0_61 = arith.constant 0 : index
    %c0_62 = arith.constant 0 : index
    %62 = vector.load %arg4[%61, %c7, %c0_61, %c0_62] : memref<3x9x4x128xbf16, #tpu.memory_space<vmem>>, vector<1x1x4x128xbf16>
    %63 = vector.shape_cast %62 : vector<1x1x4x128xbf16> to vector<4x128xbf16>
    %cst_63 = arith.constant dense<0.000000e+00> : vector<64x128xf32>
    %64 = tpu.matmul %60, %63, %cst_63 {dimension_numbers = #tpu.dot_dimension_numbers<[1], [0], [0], [1], [0, 0, 1, 1], [], []>} : vector<64x4xbf16>, vector<4x128xbf16>, vector<64x128xf32> -> vector<64x128xf32>
    %65 = arith.addf %57, %64 : vector<64x128xf32>
    %c0_64 = arith.constant 0 : index
    %c0_65 = arith.constant 0 : index
    %c2_66 = arith.constant 2 : index
    %c2_67 = arith.constant 2 : index
    %c0_68 = arith.constant 0 : index
    %66 = vector.load %arg3[%c0_64, %c0_65, %c2_66, %c2_67, %c0_68] : memref<1x1x10x10x4xbf16, #tpu.memory_space<vmem>>, vector<1x1x8x8x4xbf16>
    %67 = vector.shape_cast %66 : vector<1x1x8x8x4xbf16> to vector<8x8x4xbf16>
    %68 = vector.shape_cast %67 : vector<8x8x4xbf16> to vector<64x4xbf16>
    %69 = arith.index_cast %arg2 : i32 to index
    %c8 = arith.constant 8 : index
    %c0_69 = arith.constant 0 : index
    %c0_70 = arith.constant 0 : index
    %70 = vector.load %arg4[%69, %c8, %c0_69, %c0_70] : memref<3x9x4x128xbf16, #tpu.memory_space<vmem>>, vector<1x1x4x128xbf16>
    %71 = vector.shape_cast %70 : vector<1x1x4x128xbf16> to vector<4x128xbf16>
    %cst_71 = arith.constant dense<0.000000e+00> : vector<64x128xf32>
    %72 = tpu.matmul %68, %71, %cst_71 {dimension_numbers = #tpu.dot_dimension_numbers<[1], [0], [0], [1], [0, 0, 1, 1], [], []>} : vector<64x4xbf16>, vector<4x128xbf16>, vector<64x128xf32> -> vector<64x128xf32>
    %73 = arith.addf %65, %72 : vector<64x128xf32>
    %c0_72 = arith.constant 0 : index
    %c0_73 = arith.constant 0 : index
    %74 = vector.load %arg7[%c0_72, %c0_73] : memref<64x128xf32, #tpu.memory_space<vmem>>, vector<64x128xf32>
    %75 = arith.addf %74, %73 : vector<64x128xf32>
    %c0_74 = arith.constant 0 : index
    %c0_75 = arith.constant 0 : index
    %76 = vector.load %arg7[%c0_74, %c0_75] : memref<64x128xf32, #tpu.memory_space<vmem>>, vector<64x128xf32>
    tpu.vector_store %arg7[%c0_74, %c0_75], %75 {strides = array<i32>} : memref<64x128xf32, #tpu.memory_space<vmem>>, vector<64x128xf32>,
    %c2_i32 = arith.constant 2 : i32
    %77 = arith.cmpi eq, %arg2, %c2_i32 : i32
    %78 = arith.extui %77 : i1 to i32
    %c0_i32_76 = arith.constant 0 : i32
    %79 = arith.cmpi ne, %78, %c0_i32_76 : i32
    scf.if %79 {
      %c0_77 = arith.constant 0 : index
      %c0_78 = arith.constant 0 : index
      %80 = vector.load %arg7[%c0_77, %c0_78] : memref<64x128xf32, #tpu.memory_space<vmem>>, vector<64x128xf32>
      %c0_79 = arith.constant 0 : index
      %c0_80 = arith.constant 0 : index
      %81 = vector.load %arg5[%c0_79, %c0_80] : memref<1x128xf32, #tpu.memory_space<vmem>>, vector<1x128xf32>
      %82 = vector.broadcast %81 : vector<1x128xf32> to vector<64x128xf32>
      %83 = arith.addf %80, %82 : vector<64x128xf32>
      %c0_81 = arith.constant 0 : index
      %c0_82 = arith.constant 0 : index
      %c0_83 = arith.constant 0 : index
      %c0_84 = arith.constant 0 : index
      %84 = vector.load %arg6[%c0_81, %c0_82, %c0_83, %c0_84] : memref<1x1x64x128xf32, #tpu.memory_space<vmem>>, vector<1x1x64x128xf32>
      %85 = vector.shape_cast %84 : vector<1x1x64x128xf32> to vector<64x128xf32>
      %86 = vector.shape_cast %83 : vector<64x128xf32> to vector<1x1x64x128xf32>
      tpu.vector_store %arg6[%c0_81, %c0_82, %c0_83, %c0_84], %86 {strides = array<i32>} : memref<1x1x64x128xf32, #tpu.memory_space<vmem>>, vector<1x1x64x128xf32>,
    } else {
    }
    return
  }
  func.func @transform_0(%arg0: i32, %arg1: i32, %arg2: i32) -> (i32, i32, i32, i32, i32) {
    %c1_i32 = arith.constant 1 : i32
    %0 = arith.muli %arg1, %c1_i32 : i32
    %1 = arith.addi %0, %arg2 : i32
    %c0_i32 = arith.constant 0 : i32
    %c0_i32_0 = arith.constant 0 : i32
    %c0_i32_1 = arith.constant 0 : i32
    %c0_i32_2 = arith.constant 0 : i32
    return %arg0, %1, %c0_i32, %c0_i32_0, %c0_i32_1 : i32, i32, i32, i32, i32
  }
  func.func @transform_1(%arg0: i32, %arg1: i32, %arg2: i32) -> (i32, i32, i32, i32) {
    %c0_i32 = arith.constant 0 : i32
    %c0_i32_0 = arith.constant 0 : i32
    %c0_i32_1 = arith.constant 0 : i32
    %c0_i32_2 = arith.constant 0 : i32
    %c0_i32_3 = arith.constant 0 : i32
    return %c0_i32, %c0_i32_0, %c0_i32_1, %c0_i32_2 : i32, i32, i32, i32
  }
  func.func @transform_2(%arg0: i32, %arg1: i32, %arg2: i32) -> (i32, i32) {
    %c0_i32 = arith.constant 0 : i32
    %c0_i32_0 = arith.constant 0 : i32
    %c0_i32_1 = arith.constant 0 : i32
    return %c0_i32, %c0_i32_0 : i32, i32
  }
  func.func @transform_3(%arg0: i32, %arg1: i32, %arg2: i32) -> (i32, i32, i32, i32) {
    %c0_i32 = arith.constant 0 : i32
    %c0_i32_0 = arith.constant 0 : i32
    %c0_i32_1 = arith.constant 0 : i32
    return %arg0, %arg1, %c0_i32, %c0_i32_0 : i32, i32, i32, i32
  }
}

</mosaic_0001>

<bundles_post_ra>
// kernel: _forward_impl.1
= control target key start
LH: loop header
LB: loop body
LE: loop exit
PB: predicated region body
PF: predicated region fallthrough
CT: control target
= control target key end

     0   :  { %s1978_s12 = smov 0   ;;  %s1980_s13 = smov 0   ;;  %s2457_s0 = inlined_call_operand.vmem [shape: bf16[2,10,10,10,4], index: 0, kind: input, shape index: {}]   ;;  %s2458_s1 = inlined_call_operand.vmem [shape: bf16[3,9,4,128], index: 1, kind: input, shape index: {}]   ;;  %s2459_s2 = inlined_call_operand.vmem [shape: f32[1,128], index: 2, kind: input, shape index: {}]   ;;  %s2460_s3 = inlined_call_operand.vmem [shape: f32[2,8,64,128], index: 3, kind: output, shape index: {}]  }
   0x1   :  { %s1982_s14 = smov 0   ;;  %s1984_s15 = smov 0  }
   0x2   :  { %s1986_s16 = smov 0   ;;  %s1988_s17 = smov 0  }
   0x3   :  { %s1990_s18 = smov 0  }
   0x4 LB: > { %s25_s19 = sadd.s32 1, %s1943_s15  ;;  %s28_s20 = sadd.s32 1, %s1947_s16  ;;  %s1955_s18 = sphi %s1990_s18, %s13_s18   ;;  %s1951_s17 = sphi %s1988_s17, %s2470_s17   ;;  %s1947_s16 = sphi %s1986_s16, %s2469_s16   ;;  %s1943_s15 = sphi %s1984_s15, %s2468_s15   ;;  %s1939_s14 = sphi %s1982_s14, %s2467_s14   ;;  %s1935_s13 = sphi %s1980_s13, %s2466_s13   ;;  %s1931_s12 = sphi %s1978_s12, %s2465_s12  }
   0x5   : > { %p26_p0 = scmp.ge.s32.totalorder %s25_s19, 3  ;;  %p1627_p1 = scmp.ge.s32.totalorder %s1955_s18, 1 }
   0x6   : > { %p168_p2 = scmp.lt.s32.totalorder %s1955_s18, 49  ;;  %s32_s21 = sadd.s32 1, %s1951_s17 }
   0x7   : > { %s2472_s19 = smov (%p26_p0, %s25_s19), 0  ;;  %s2474_s20 = smov (!%p26_p0, %s28_s20), %s1947_s16 }
   0x8   : > { %p169_p3 = pnand %p1627_p1, %p168_p2  ;;  %p30_p4 = scmp.ge.s32.totalorder %s2474_s20, 8 }
   0x9   : > { %s201_s22 = sadd.s32 (!%p169_p3), %s1931_s12, %s1935_s13  ;;  %p202_p6 = scmp.lt.s32.totalorder (!%p169_p3), %s1939_s14, 1 }
   0xa   : > { %s2476_s20 = smov (%p30_p4, %s2474_s20), 0  ;;  %s2478_s21 = smov (!%p30_p4, %s32_s21), %s1951_s17 }
   0xb   : > { %p34_p5 = scmp.ge.s32.totalorder %s2478_s21, 2  ;;  %172 = sbr.rel (%p169_p3) target bundleno = 345 (0x159), region = 32 }
   0xc   : > { %p204_p7 = scmp.lt.s32.totalorder (!%p169_p3), %s201_s22, 9  ;;  %p214_p8 = scmp.lt.s32.totalorder (!%p169_p3), %s1935_s13, 7 }
   0xd   : > { %s2480_s21 = smov (%p34_p5, %s2478_s21), 0  ;;  %p1632_p9 = scmp.ne.s32.totalorder (!%p169_p3), %s1931_s12, 0 }
  0x10   : > { %s2482_s14 = smov (!%p202_p6, %s1939_s14), 1  ;;  %s2484_s22 = smov (!%p204_p7, %s201_s22), 9 }
  0x11   : > { %s1842_s23 = smul.u32 200, %s2482_s14  ;;  %s1630_s25 = sshll.u32 %s2482_s14, 6 }
  0x12   : > { %s1841_s24 = smul.u32 20, %s2484_s22  ;;  %s2486_s13 = smov (!%p214_p8, %s1935_s13), 7 }
  0x13   : > { %s1629_s28 = sshll.u32 %s2486_s13, 3  ;;  %225 = sbr.rel (%p1632_p9) target bundleno = 33 (0x21), region = 36 }
  0x14   : > { %s208_s26 = sadd.s32 %s1842_s23, %s1841_s24  ;;  %s218_s5 = sadd.s32 %s1630_s25, %s1629_s28 }
  0x15   : > { %s1628_s27 = sshll.u32 %s208_s26, 2  ;;  %s1631_s6 = sshll.u32 %s218_s5, 3 }
  0x16   : > { %s2031_s4 = scalar_lea.vmem %s2457_s0, %s1628_s27  ;;  %s2036_s9 = scalar_lea.vmem %s2460_s3, %s1631_s6 }
  0x18   : > { %v1957_v0 = vmov 0.0  }
  0x19   : > { %226 = vst [vmem:[#allocation2 + $0x30] sm:$0xff] %v1957_v0 }
  0x1a   : > { %227 = vst [vmem:[#allocation2] sm:$0xff] %v1957_v0 }
  0x1b   : > { %228 = vst [vmem:[#allocation2 + $0x18] sm:$0xff] %v1957_v0 }
  0x1c   : > { %229 = vst [vmem:[#allocation2 + $0x10] sm:$0xff] %v1957_v0 }
  0x1d   : > { %230 = vst [vmem:[#allocation2 + $0x8] sm:$0xff] %v1957_v0 }
  0x1e   : > { %231 = vst [vmem:[#allocation2 + $0x20] sm:$0xff] %v1957_v0 }
  0x1f   : > { %232 = vst [vmem:[#allocation2 + $0x28] sm:$0xff] %v1957_v0 }
  0x20   : > { %233 = vst [vmem:[#allocation2 + $0x38] sm:$0xff] %v1957_v0 }
  0x21 PF: > { %s1829_s10 = smul.u32 18, %s1931_s12  ;;  %vm398_vm0 = vcmask 1041408   ;;  %v236_v1 = vld [vmem:[%s2031_s4 + $0x10] sm:$0xf]  ;;  %v237_v2 = vld [vmem:[%s2031_s4 + $0x18] sm:$0xf] }
  0x22   : > { %v2043_v3 = vld [vmem:[%s2031_s4 + $0x14] sm:$0x1]  ;;  %v2046_v4 = vld [vmem:[%s2031_s4 + $0x1c] sm:$0x1]  ;;  %vm254_vm1 = vsmask.f32 3328 }
  0x23   : > { %s2051_s14 = scalar_lea.vmem %s2458_s1, %s1829_s10  ;;  %vm255_vm2 = vsmask.f32 7440  ;;  %v286_v5 = vshrl.u32 %v236_v1, 16  ;;  %v289_v6 = vshll.u32 %v236_v1, 16  ;;  %v295_v7 = vshll.u32 %v2043_v3, 16  ;;  %p1822_p10 = scmp.ne.s32.totalorder %s1931_s12, 2 }
  0x24   : > { %v1635_v8 = vld [vmem:[%s2051_s14 + $0x2] sm:$0x3]  ;;  %v300_v9 = vshrl.u32 %v237_v2, 16  ;;  %v303_v10 = vshll.u32 %v237_v2, 16  ;;  %v309_v11 = vshll.u32 %v2046_v4, 16  ;;  %vm385_vm3 = vcmask 31744   ;;  %vm2067_vm4 = vmor %vm254_vm1, %vm255_vm2 }
  0x25   : > { %v400_v12 = vsel %vm398_vm0, %v1635_v8, 0  ;;  %v288_v13 = vrot.slane %v286_v5, 4  ;;  %v291_v14 = vrot.slane %v289_v6, 5  ;;  %v297_v15 = vrot.slane %v295_v7, 5  ;;  %v238_v16 = vld [vmem:[%s2031_s4 + $0x20] sm:$0xf] }
  0x26   : > { %1838 = vmatpush.bf16.msra.mxu1 %v400_v12  ;;  %1839 = vmatpush.bf16.msra.mxu2 %v400_v12  ;;  %v302_v17 = vrot.slane %v300_v9, 4  ;;  %v305_v18 = vrot.slane %v303_v10, 5  ;;  %v311_v19 = vrot.slane %v309_v11, 5  ;;  %v239_v20 = vld [vmem:[%s2031_s4 + $0x28] sm:$0xf]  ;;  %v314_v21 = vshrl.u32 %v238_v16, 16 }
  0x27   : > { %1840 = vmatpush.bf16.msra.mxu3 %v400_v12  ;;  %409 = vmatpush.bf16.msra.mxu0 %v400_v12  ;;  %v292_v22 = vor.u32 %v291_v14, %v288_v13  ;;  %v2060_v23 = vld [vmem:[%s2031_s4 + $0x24] sm:$0x1]  ;;  %v2063_v24 = vld [vmem:[%s2031_s4 + $0x2c] sm:$0x1]  ;;  %v317_v25 = vshll.u32 %v238_v16, 16  ;;  %v328_v26 = vshrl.u32 %v239_v20, 16 }
  0x28   : > { %v306_v28 = vor.u32 %v305_v18, %v302_v17  ;;  %v316_v29 = vrot.slane %v314_v21, 4  ;;  %v323_v30 = vshll.u32 %v2060_v23, 16  ;;  %v331_v31 = vshll.u32 %v239_v20, 16  ;;  %v240_v32 = vld [vmem:[%s2031_s4 + $0x30] sm:$0xf] }
  0x29   : > { %v293_v33 = vrot.slane %v292_v22, 4  ;;  %v319_v34 = vrot.slane %v317_v25, 5  ;;  %v330_v35 = vrot.slane %v328_v26, 4  ;;  %v337_v36 = vshll.u32 %v2063_v24, 16  ;;  %v2075_v40 = vld [vmem:[%s2031_s4 + $0x34] sm:$0x1] }
  0x2a   : > { %v307_v37 = vrot.slane %v306_v28, 4  ;;  %v325_v38 = vrot.slane %v323_v30, 5  ;;  %v333_v39 = vrot.slane %v331_v31, 5  ;;  %v342_v41 = vshrl.u32 %v240_v32, 16  ;;  %v241_v45 = vld [vmem:[%s2031_s4 + $0x38] sm:$0xf] }
  0x2b   : > { %v298_v42 = vsel %vm2067_vm4, %v293_v33, %v297_v15  ;;  %v320_v43 = vor.u32 %v319_v34, %v316_v29  ;;  %v339_v44 = vrot.slane %v337_v36, 5  ;;  %v2081_v46 = vld [vmem:[%s2031_s4 + $0x3c] sm:$0x1]  ;;  %v345_v47 = vshll.u32 %v240_v32, 16  ;;  %v1669_v60 = vld [vmem:[%s2051_s14 + $0x4] sm:$0x3] }
  0x2c   : > { %v312_v48 = vsel %vm2067_vm4, %v307_v37, %v311_v19  ;;  %v375_v49 = vunpack.c.l.b16 %v298_v42  ;;  %v334_v50 = vor.u32 %v333_v39, %v330_v35  ;;  %v344_v51 = vrot.slane %v342_v41, 4  ;;  %v234_v1 = vld [vmem:[%s2031_s4] sm:$0xf]  ;;  %v2092_v2 = vld [vmem:[%s2031_s4 + $0x4] sm:$0x1] }
  0x2d   : > { %v376_v52 = vunpack.c.l.b16 %v312_v48  ;;  %v321_v53 = vrot.slane %v320_v43, 4  ;;  %v347_v54 = vrot.slane %v345_v47, 5  ;;  %v351_v55 = vshll.u32 %v2075_v40, 16  ;;  %v235_v9 = vld [vmem:[%s2031_s4 + $0x8] sm:$0xf] }
  0x2e   : > { %v335_v56 = vrot.slane %v334_v50, 4  ;;  %v356_v57 = vshrl.u32 %v241_v45, 16  ;;  %v359_v58 = vshll.u32 %v241_v45, 16  ;;  %v365_v59 = vshll.u32 %v2081_v46, 16  ;;  %v247_v15 = vld [vmem:[%s2031_s4 + $0xc] sm:$0x1] }
  0x2f   : > { %v382_v61 = vpack.c.b16 %v376_v52, %v375_v49  ;;  %v326_v62 = vsel %vm2067_vm4, %v321_v53, %v325_v38  ;;  %v348_v63 = vor.u32 %v347_v54, %v344_v51  ;;  %v353_v0 = vrot.slane %v351_v55, 5  ;;  %v1683_v25 = vld [vmem:[%s2051_s14 + $0x6] sm:$0x3]  ;;  %v245_v26 = vld [vmem:[%s2051_s14] sm:$0x3] }
  0x30   : > { %v340_v5 = vsel %vm2067_vm4, %v335_v56, %v339_v44  ;;  %v377_v6 = vunpack.c.l.b16 %v326_v62  ;;  %v358_v7 = vrot.slane %v356_v57, 4  ;;  %v361_v8 = vrot.slane %v359_v58, 5  ;;  %v1721_v31 = vld [vmem:[%s2051_s14 + $0x8] sm:$0x3]  ;;  %v1642_v36 = vld [vmem:[%s2031_s4] sm:$0xf] }
  0x31   : > { %1637 = vmatmul.msk.bf16.vlgmr.msra.gmra.mxu1 %vm385_vm3, %v382_v61  ;;  %v378_v10 = vunpack.c.l.b16 %v340_v5  ;;  %v349_v11 = vrot.slane %v348_v63, 4  ;;  %v367_v12 = vrot.slane %v365_v59, 5  ;;  %v583_v13 = vsel %vm398_vm0, %v1669_v60, 0  ;;  %v1825_v42 = vld [vmem:[%s2031_s4 + $0x4] sm:$0xf0] }
  0x32   : > { %v362_v14 = vor.u32 %v361_v8, %v358_v7  ;;  %592 = vmatpush.bf16.msrb.mxu2 %v583_v13  ;;  %v258_v16 = vshrl.u32 %v234_v1, 16  ;;  %v261_v17 = vshll.u32 %v234_v1, 16  ;;  %v267_v18 = vshll.u32 %v2092_v2, 16  ;;  %v495_v43 = vld [vmem:[%s2031_s4] sm:$0xe] }
  0x33   : > { %v383_v19 = vpack.c.b16 %v378_v10, %v377_v6  ;;  %v354_v20 = vsel %vm2067_vm4, %v349_v11, %v353_v0  ;;  %v272_v21 = vshrl.u32 %v235_v9, 16  ;;  %v275_v22 = vshll.u32 %v235_v9, 16  ;;  %v496_v49 = vld [vmem:[%s2031_s4 + $0x8] sm:$0xe]  ;;  %v1757_v50 = vld [vmem:[%s2051_s14 + $0xc] sm:$0x3] }
  0x34   : > { %v363_v28 = vrot.slane %v362_v14, 4  ;;  %v260_v29 = vrot.slane %v258_v16, 4  ;;  %v263_v30 = vrot.slane %v261_v17, 5  ;;  %v379_v32 = vunpack.c.l.b16 %v354_v20  ;;  %v1704_v55 = vld [vmem:[%s2031_s4 + $0x8] sm:$0xf] }
  0x35   : > { %1638 = vmatmul.msk.bf16.vlgmr.msra.gmra.mxu2 %vm385_vm3, %v383_v19  ;;  %v274_v33 = vrot.slane %v272_v21, 4  ;;  %v277_v34 = vrot.slane %v275_v22, 5  ;;  %v281_v35 = vshll.u32 %v247_v15, 16  ;;  %v269_v39 = vrot.slane %v267_v18, 5  ;;  %v2126_v63 = vld [vmem:[%s2031_s4 + $0xc] sm:$0x1] }
  0x36   : > { %v368_v37 = vsel %vm2067_vm4, %v363_v28, %v367_v12  ;;  %v264_v38 = vor.u32 %v263_v30, %v260_v29  ;;  %v524_v41 = vrot.slane %v2092_v2, 5  ;;  %v668_v48 = vsel %vm398_vm0, %v1683_v25, 0  ;;  %v1706_v5 = vld [vmem:[%s2031_s4 + $0x10] sm:$0xf]  ;;  %v2138_v10 = vld [vmem:[%s2031_s4 + $0x14] sm:$0x1] }
  0x37   : > { %v380_v44 = vunpack.c.l.b16 %v368_v37  ;;  %v278_v45 = vor.u32 %v277_v34, %v274_v33  ;;  %v283_v47 = vrot.slane %v281_v35, 5  ;;  %v528_v52 = vrot.slane %v247_v15, 5  ;;  %677 = vmatpush.bf16.msrb.mxu3 %v668_v48  ;;  %v1795_v16 = vld [vmem:[%s2051_s14 + $0xe] sm:$0x3]  ;;  %v1743_v17 = vld [vmem:[%s2051_s14 + $0xa] sm:$0x3] }
  0x38   : > { %v265_v51 = vrot.slane %v264_v38, 4  ;;  %v464_v53 = vsel %vm398_vm0, %v245_v26, 0  ;;  %v864_v54 = vsel %vm398_vm0, %v1721_v31, 0  ;;  %vm519_vm5 = vcmask 1042432   ;;  %v1817_v22 = vld [vmem:[%s2051_s14 + $0x10] sm:$0x3] }
  0x39   : > { %v384_v56 = vpack.c.b16 %v380_v44, %v379_v32  ;;  %v279_v57 = vrot.slane %v278_v45, 4  ;;  %473 = vmatpush.bf16.msrb.mxu1 %v464_v53  ;;  %873 = vmatpush.bf16.msrb.mxu0 %v864_v54  ;;  %vm520_vm6 = vcmask 1046532   ;;  %v1643_v59 = vor.u32 %v1825_v42, %v1642_v36  ;;  %v497_v35 = vld [vmem:[%s2031_s4 + $0x10] sm:$0xe]  ;;  %v498_v42 = vld [vmem:[%s2031_s4 + $0x18] sm:$0xe] }
  0x3a   : > { %v270_v58 = vsel %vm2067_vm4, %v265_v51, %v269_v39  ;;  %vm2121_vm7 = vmor %vm519_vm5, %vm520_vm6  ;;  %v1660_v61 = vrot.slane %v495_v43, 9  ;;  %v1661_v62 = vrot.slane %v496_v49, 9  ;;  %v1073_v2 = vsel %vm398_vm0, %v1757_v50, 0  ;;  %v1708_v39 = vld [vmem:[%s2031_s4 + $0x18] sm:$0xf] }
  0x3b   : > { %1639 = vmatmul.msk.bf16.vlgmr.msra.gmra.mxu3 %vm385_vm3, %v384_v56  ;;  %v284_v0 = vsel %vm2067_vm4, %v279_v57, %v283_v47  ;;  %v373_v1 = vunpack.c.l.b16 %v270_v58  ;;  %v724_v6 = vshrl.u32 %v1704_v55, 16  ;;  %1082 = vmatpush.bf16.msra.mxu2 %v1073_v2  ;;  %v727_v11 = vshll.u32 %v1704_v55, 16  ;;  %v1830_v43 = vld [vmem:[%s2031_s4 + $0xc] sm:$0xf0]  ;;  %v1710_v47 = vld [vmem:[%s2031_s4 + $0x20] sm:$0xf] }
  0x3c   : > { %v374_v7 = vunpack.c.l.b16 %v284_v0  ;;  %v525_v8 = vsel %vm2121_vm7, %v1660_v61, %v524_v41  ;;  %v529_v9 = vsel %vm2121_vm7, %v1661_v62, %v528_v52  ;;  %v733_v15 = vshll.u32 %v2126_v63, 16  ;;  %v1686_v41 = vld [vmem:[%s2031_s4 + $0x8] sm:$0xf]  ;;  %v1826_v61 = vld [vmem:[%s2031_s4 + $0x14] sm:$0xf0] }
  0x3d   : > { %v558_v12 = vunpack.c.l.b16 %v525_v8  ;;  %v559_v13 = vunpack.c.l.b16 %v529_v9  ;;  %v726_v14 = vrot.slane %v724_v6, 4  ;;  %v729_v19 = vrot.slane %v727_v11, 5 }
  0x3e   : > { %v381_v18 = vpack.c.b16 %v374_v7, %v373_v1  ;;  %v738_v20 = vshrl.u32 %v1706_v5, 16  ;;  %v741_v21 = vshll.u32 %v1706_v5, 16  ;;  %v747_v25 = vshll.u32 %v2138_v10, 16 }
  0x3f   : > { %v566_v26 = vpack.c.b16 %v559_v13, %v558_v12  ;;  %v730_v28 = vor.u32 %v729_v19, %v726_v14  ;;  %v735_v31 = vrot.slane %v733_v15, 5  ;;  %v1269_v32 = vsel %vm398_vm0, %v1795_v16, 0 }
  0x40   : > { %1636 = vmatmul.msk.bf16.vlgmr.msra.gmra.mxu0 %vm385_vm3, %v381_v18  ;;  %v740_v29 = vrot.slane %v738_v20, 4  ;;  %v743_v30 = vrot.slane %v741_v21, 5  ;;  %v988_v33 = vsel %vm398_vm0, %v1743_v17, 0  ;;  %v1393_v34 = vsel %vm398_vm0, %v1817_v22, 0  ;;  %1278 = vmatpush.bf16.msra.mxu3 %v1269_v32  ;;  %v499_v18 = vld [vmem:[%s2031_s4 + $0x20] sm:$0xe] }
  0x41   : > { %1656 = vmatmul.msk.bf16.vlgmr.msrb.gmra.mxu1 %vm385_vm3, %v1643_v59  ;;  %v731_v36 = vrot.slane %v730_v28, 4  ;;  %v749_v38 = vrot.slane %v747_v25, 5  ;;  %1402 = vmatpush.bf16.msra.mxu0 %v1393_v34  ;;  %v1662_v45 = vrot.slane %v497_v35, 9  ;;  %v532_v49 = vrot.slane %v2043_v3, 5  ;;  %v1646_v59 = vld [vmem:[%s2031_s4 + $0x10] sm:$0xf] }
  0x42   : > { %v744_v37 = vor.u32 %v743_v30, %v740_v29  ;;  %997 = vmatpush.bf16.msra.mxu1 %v988_v33  ;;  %v752_v50 = vshrl.u32 %v1708_v39, 16  ;;  %v755_v51 = vshll.u32 %v1708_v39, 16  ;;  %v1663_v53 = vrot.slane %v498_v42, 9  ;;  %v2168_v3 = vld [vmem:[%s2031_s4 + $0x1c] sm:$0x1] }
  0x43   : > { %v736_v48 = vsel %vm2067_vm4, %v731_v36, %v735_v31  ;;  %v536_v54 = vrot.slane %v2046_v4, 5  ;;  %v1687_v55 = vor.u32 %v1830_v43, %v1686_v41  ;;  %v766_v56 = vshrl.u32 %v1710_v47, 16  ;;  %v2173_v4 = vld [vmem:[%s2031_s4 + $0x24] sm:$0x1]  ;;  %v1712_v25 = vld [vmem:[%s2031_s4 + $0x28] sm:$0xf] }
  0x44   : > { %v745_v44 = vrot.slane %v744_v37, 4  ;;  %v839_v57 = vunpack.c.l.b16 %v736_v48  ;;  %v769_v62 = vshll.u32 %v1710_v47, 16  ;;  %v533_v0 = vsel %vm2121_vm7, %v1662_v45, %v532_v49  ;;  %v1690_v28 = vld [vmem:[%s2031_s4 + $0x18] sm:$0xf]  ;;  %v500_v29 = vld [vmem:[%s2031_s4 + $0x28] sm:$0xe] }
  0x45   : > { %1670 = vmatmul.msk.bf16.vlgmr.msrb.gmra.mxu2 %vm385_vm3, %v566_v26  ;;  %v754_v1 = vrot.slane %v752_v50, 4  ;;  %v757_v2 = vrot.slane %v755_v51, 5  ;;  %v768_v5 = vrot.slane %v766_v56, 4  ;;  %v537_v6 = vsel %vm2121_vm7, %v1663_v53, %v536_v54  ;;  %v1714_v26 = vld [vmem:[%s2031_s4 + $0x30] sm:$0xf] }
  0x46   : > { %v750_v52 = vsel %vm2067_vm4, %v745_v44, %v749_v38  ;;  %v771_v7 = vrot.slane %v769_v62, 5  ;;  %v1647_v9 = vor.u32 %v1826_v61, %v1646_v59  ;;  %v560_v11 = vunpack.c.l.b16 %v533_v0  ;;  %v1831_v30 = vld [vmem:[%s2031_s4 + $0x1c] sm:$0xf0]  ;;  %v1827_v45 = vld [vmem:[%s2031_s4 + $0x24] sm:$0xf0] }
  0x47   : > { %v840_v58 = vunpack.c.l.b16 %v750_v52  ;;  %v761_v12 = vshll.u32 %v2168_v3, 16  ;;  %v561_v13 = vunpack.c.l.b16 %v537_v6  ;;  %v758_v14 = vor.u32 %v757_v2, %v754_v1  ;;  %v1650_v44 = vld [vmem:[%s2031_s4 + $0x20] sm:$0xf]  ;;  %v2198_v48 = vld [vmem:[%s2031_s4 + $0x2c] sm:$0x1] }
  0x48   : > { %v772_v15 = vor.u32 %v771_v7, %v768_v5  ;;  %v775_v16 = vshll.u32 %v2173_v4, 16  ;;  %v1664_v31 = vrot.slane %v499_v18, 9  ;;  %v540_v32 = vrot.slane %v2060_v23, 5  ;;  %v1716_v0 = vld [vmem:[%s2031_s4 + $0x38] sm:$0xf] }
  0x49   : > { %v847_v8 = vpack.c.b16 %v840_v58, %v839_v57  ;;  %v763_v17 = vrot.slane %v761_v12, 5  ;;  %v567_v19 = vpack.c.b16 %v561_v13, %v560_v11  ;;  %v759_v20 = vrot.slane %v758_v14, 4  ;;  %v1718_v2 = vld [vmem:[%s2031_s4 + $0x40] sm:$0xf]  ;;  %v502_v13 = vld [vmem:[%s2031_s4 + $0x38] sm:$0xe] }
  0x4a   : > { %v773_v21 = vrot.slane %v772_v15, 4  ;;  %v777_v22 = vrot.slane %v775_v16, 5  ;;  %v780_v33 = vshrl.u32 %v1712_v25, 16  ;;  %v783_v34 = vshll.u32 %v1712_v25, 16  ;;  %v1694_v16 = vld [vmem:[%s2031_s4 + $0x28] sm:$0xf] }
  0x4b   : > { %1700 = vmatmul.msk.bf16.vlgmr.msrb.gmra.mxu3 %vm385_vm3, %v1687_v55  ;;  %v764_v35 = vsel %vm2067_vm4, %v759_v20, %v763_v17  ;;  %v794_v37 = vshrl.u32 %v1714_v26, 16  ;;  %v797_v38 = vshll.u32 %v1714_v26, 16  ;;  %v1665_v39 = vrot.slane %v500_v29, 9  ;;  %v1832_v17 = vld [vmem:[%s2031_s4 + $0x2c] sm:$0xf0] }
  0x4c   : > { %v778_v36 = vsel %vm2067_vm4, %v773_v21, %v777_v22  ;;  %v544_v41 = vrot.slane %v2063_v24, 5  ;;  %v1691_v42 = vor.u32 %v1831_v30, %v1690_v28  ;;  %v841_v43 = vunpack.c.l.b16 %v764_v35  ;;  %v2203_v24 = vld [vmem:[%s2031_s4 + $0x34] sm:$0x1]  ;;  %v2224_v30 = vld [vmem:[%s2031_s4 + $0x3c] sm:$0x1] }
  0x4d   : > { %v842_v23 = vunpack.c.l.b16 %v778_v36  ;;  %v541_v47 = vsel %vm2121_vm7, %v1664_v31, %v540_v32  ;;  %v782_v49 = vrot.slane %v780_v33, 4  ;;  %v785_v50 = vrot.slane %v783_v34, 5  ;;  %v2227_v35 = vld [vmem:[%s2031_s4 + $0x44] sm:$0x1]  ;;  %v1654_v36 = vld [vmem:[%s2031_s4 + $0x30] sm:$0xf] }
  0x4e   : > { %v796_v51 = vrot.slane %v794_v37, 4  ;;  %v799_v52 = vrot.slane %v797_v38, 5  ;;  %v545_v53 = vsel %vm2121_vm7, %v1665_v39, %v544_v41  ;;  %v1651_v55 = vor.u32 %v1827_v45, %v1650_v44  ;;  %v1828_v37 = vld [vmem:[%s2031_s4 + $0x34] sm:$0xf0] }
  0x4f   : > { %v848_v54 = vpack.c.b16 %v842_v23, %v841_v43  ;;  %v562_v56 = vunpack.c.l.b16 %v541_v47  ;;  %v789_v57 = vshll.u32 %v2198_v48, 16  ;;  %v563_v58 = vunpack.c.l.b16 %v545_v53  ;;  %v1778_v47 = vld [vmem:[%s2031_s4 + $0x10] sm:$0xf] }
  0x50   : > { %1722 = vmatmul.msk.bf16.vlgmr.msrb.gmra.mxu0 %vm385_vm3, %v847_v8  ;;  %v786_v59 = vor.u32 %v785_v50, %v782_v49  ;;  %v800_v61 = vor.u32 %v799_v52, %v796_v51  ;;  %v803_v62 = vshll.u32 %v2203_v24, 16  ;;  %v808_v11 = vshrl.u32 %v1716_v0, 16  ;;  %v1780_v49 = vld [vmem:[%s2031_s4 + $0x18] sm:$0xf] }
  0x51   : > { %1657 = vmatmul.msk.bf16.gmra.mxu1 %vm385_vm3, %v1647_v9  ;;  %v791_v1 = vrot.slane %v789_v57, 5  ;;  %v568_v5 = vpack.c.b16 %v563_v58, %v562_v56  ;;  %v501_v9 = vld [vmem:[%s2031_s4 + $0x30] sm:$0xe]  ;;  %v811_v12 = vshll.u32 %v1716_v0, 16  ;;  %v822_v14 = vshrl.u32 %v1718_v2, 16 }
  0x52   : > { %v787_v6 = vrot.slane %v786_v59, 4  ;;  %v801_v7 = vrot.slane %v800_v61, 4  ;;  %v805_v8 = vrot.slane %v803_v62, 5  ;;  %v825_v15 = vshll.u32 %v1718_v2, 16 }
  0x53   : > { %v1666_v20 = vrot.slane %v501_v9, 9  ;;  %v548_v21 = vrot.slane %v2075_v40, 5  ;;  %v1667_v22 = vrot.slane %v502_v13, 9  ;;  %v552_v25 = vrot.slane %v2081_v46, 5 }
  0x54   : > { %v792_v18 = vsel %vm2067_vm4, %v787_v6, %v791_v1  ;;  %v810_v26 = vrot.slane %v808_v11, 4  ;;  %v813_v28 = vrot.slane %v811_v12, 5  ;;  %v1695_v29 = vor.u32 %v1832_v17, %v1694_v16 }
  0x55   : > { %1671 = vmatmul.msk.bf16.gmra.mxu2 %vm385_vm3, %v567_v19  ;;  %v806_v19 = vsel %vm2067_vm4, %v801_v7, %v805_v8  ;;  %v824_v31 = vrot.slane %v822_v14, 4  ;;  %v827_v32 = vrot.slane %v825_v15, 5  ;;  %v843_v33 = vunpack.c.l.b16 %v792_v18  ;;  %v1833_v8 = vld [vmem:[%s2031_s4 + $0x3c] sm:$0xf0] }
  0x56   : > { %v844_v34 = vunpack.c.l.b16 %v806_v19  ;;  %v549_v40 = vsel %vm2121_vm7, %v1666_v20, %v548_v21  ;;  %v553_v46 = vsel %vm2121_vm7, %v1667_v22, %v552_v25  ;;  %v814_v38 = vor.u32 %v813_v28, %v810_v26  ;;  %v1760_v28 = vld [vmem:[%s2031_s4 + $0x10] sm:$0xf] }
  0x57   : > { %v817_v39 = vshll.u32 %v2224_v30, 16  ;;  %v828_v41 = vor.u32 %v827_v32, %v824_v31  ;;  %v1655_v23 = vor.u32 %v1828_v37, %v1654_v36  ;;  %v564_v44 = vunpack.c.l.b16 %v549_v40  ;;  %v1834_v31 = vld [vmem:[%s2031_s4 + $0x14] sm:$0xf0]  ;;  %v1782_v32 = vld [vmem:[%s2031_s4 + $0x20] sm:$0xf] }
  0x58   : > { %v849_v43 = vpack.c.b16 %v844_v34, %v843_v33  ;;  %v565_v45 = vunpack.c.l.b16 %v553_v46  ;;  %v815_v50 = vrot.slane %v814_v38, 4  ;;  %v1129_v56 = vshrl.u32 %v1778_v47, 16  ;;  %v1784_v33 = vld [vmem:[%s2031_s4 + $0x28] sm:$0xf]  ;;  %v1800_v46 = vld [vmem:[%s2031_s4 + $0x10] sm:$0xe] }
  0x59   : > { %v819_v51 = vrot.slane %v817_v39, 5  ;;  %v829_v52 = vrot.slane %v828_v41, 4  ;;  %v1132_v57 = vshll.u32 %v1778_v47, 16  ;;  %v1143_v58 = vshrl.u32 %v1780_v49, 16  ;;  %v1801_v39 = vld [vmem:[%s2031_s4 + $0x18] sm:$0xe] }
  0x5a   : > { %v1146_v59 = vshll.u32 %v1780_v49, 16  ;;  %v569_v61 = vpack.c.b16 %v565_v45, %v564_v44  ;;  %v929_v62 = vrot.slane %v2126_v63, 5  ;;  %v933_v0 = vrot.slane %v2138_v10, 5  ;;  %v1779_v63 = vld [vmem:[%s2031_s4 + $0x14] sm:$0x1] }
  0x5b   : > { %1701 = vmatmul.msk.bf16.gmra.mxu3 %vm385_vm3, %v1691_v42  ;;  %v831_v42 = vshll.u32 %v2227_v35, 16  ;;  %v820_v6 = vsel %vm2067_vm4, %v815_v50, %v819_v51  ;;  %v1131_v9 = vrot.slane %v1129_v56, 4  ;;  %v1134_v11 = vrot.slane %v1132_v57, 5  ;;  %v1781_v10 = vld [vmem:[%s2031_s4 + $0x1c] sm:$0x1] }
  0x5c   : > { %v1145_v12 = vrot.slane %v1143_v58, 4  ;;  %v1148_v13 = vrot.slane %v1146_v59, 5  ;;  %v845_v17 = vunpack.c.l.b16 %v820_v6  ;;  %v1138_v20 = vshll.u32 %v1779_v63, 16  ;;  %v1728_v41 = vld [vmem:[%s2031_s4 + $0x18] sm:$0xe] }
  0x5d   : > { %v833_v53 = vrot.slane %v831_v42, 5  ;;  %v1135_v19 = vor.u32 %v1134_v11, %v1131_v9  ;;  %v1152_v22 = vshll.u32 %v1781_v10, 16  ;;  %v1729_v42 = vld [vmem:[%s2031_s4 + $0x20] sm:$0xe]  ;;  %v1171_v44 = vshrl.u32 %v1784_v33, 16 }
  0x5e   : > { %v1149_v21 = vor.u32 %v1148_v13, %v1145_v12  ;;  %v1140_v36 = vrot.slane %v1138_v20, 5  ;;  %v1174_v45 = vshll.u32 %v1784_v33, 16  ;;  %v1761_v47 = vor.u32 %v1834_v31, %v1760_v28  ;;  %v1785_v6 = vld [vmem:[%s2031_s4 + $0x2c] sm:$0x1]  ;;  %v1764_v28 = vld [vmem:[%s2031_s4 + $0x20] sm:$0xf] }
  0x5f   : > { %v834_v7 = vsel %vm2067_vm4, %v829_v52, %v833_v53  ;;  %v1136_v34 = vrot.slane %v1135_v19, 4  ;;  %v1154_v40 = vrot.slane %v1152_v22, 5  ;;  %v1808_v49 = vrot.slane %v1800_v46, 9  ;;  %v1786_v22 = vld [vmem:[%s2031_s4 + $0x30] sm:$0xf] }
  0x60   : > { %1723 = vmatmul.msk.bf16.gmra.mxu0 %vm385_vm3, %v848_v54  ;;  %v1726_v54 = vld [vmem:[%s2031_s4 + $0x8] sm:$0xe]  ;;  %v846_v18 = vunpack.c.l.b16 %v834_v7  ;;  %v1150_v37 = vrot.slane %v1149_v21, 4  ;;  %v1334_v50 = vrot.slane %v1779_v63, 5  ;;  %v1809_v53 = vrot.slane %v1801_v39, 9 }
  0x61   : > { %1658 = vmatmul.msk.bf16.gmra.mxu1 %vm385_vm3, %v1651_v55  ;;  %v1727_v55 = vld [vmem:[%s2031_s4 + $0x10] sm:$0xe]  ;;  %v1734_v1 = vrot.slane %v1726_v54, 9  ;;  %v1141_v51 = vsel %vm2067_vm4, %v1136_v34, %v1140_v36  ;;  %v1338_v54 = vrot.slane %v1781_v10, 5  ;;  %v937_v56 = vrot.slane %v2168_v3, 5 }
  0x62   : > { %v1735_v2 = vrot.slane %v1727_v55, 9  ;;  %v1155_v52 = vsel %vm2067_vm4, %v1150_v37, %v1154_v40  ;;  %v1736_v55 = vrot.slane %v1728_v41, 9  ;;  %v1737_v57 = vrot.slane %v1729_v42, 9  ;;  %v1802_v31 = vld [vmem:[%s2031_s4 + $0x20] sm:$0xe] }
  0x63   : > { %v930_v14 = vsel %vm2121_vm7, %v1734_v1, %v929_v62  ;;  %v941_v58 = vrot.slane %v2173_v4, 5  ;;  %v1173_v62 = vrot.slane %v1171_v44, 4  ;;  %v1244_v1 = vunpack.c.l.b16 %v1141_v51  ;;  %v1803_v34 = vld [vmem:[%s2031_s4 + $0x28] sm:$0xe]  ;;  %v1731_v37 = vld [vmem:[%s2031_s4 + $0x30] sm:$0xe] }
  0x64   : > { %v934_v15 = vsel %vm2121_vm7, %v1735_v2, %v933_v0  ;;  %v963_v25 = vunpack.c.l.b16 %v930_v14  ;;  %v1176_v0 = vrot.slane %v1174_v45, 5  ;;  %v1245_v2 = vunpack.c.l.b16 %v1155_v52  ;;  %v1730_v36 = vld [vmem:[%s2031_s4 + $0x28] sm:$0xe] }
  0x65   : > { %1672 = vmatmul.msk.bf16.gmra.mxu2 %vm385_vm3, %v568_v5  ;;  %v1698_v5 = vld [vmem:[%s2031_s4 + $0x38] sm:$0xf]  ;;  %v964_v26 = vunpack.c.l.b16 %v934_v15  ;;  %v1335_v7 = vsel %vm2121_vm7, %v1808_v49, %v1334_v50  ;;  %v938_v3 = vsel %vm2121_vm7, %v1736_v55, %v937_v56  ;;  %v942_v4 = vsel %vm2121_vm7, %v1737_v57, %v941_v58  ;;  %v1787_v57 = vld [vmem:[%s2031_s4 + $0x34] sm:$0x1]  ;;  %v1789_v58 = vld [vmem:[%s2031_s4 + $0x3c] sm:$0x1] }
  0x66   : > { %v1699_v16 = vor.u32 %v1833_v8, %v1698_v5  ;;  %v1783_v5 = vld [vmem:[%s2031_s4 + $0x24] sm:$0x1]  ;;  %v1339_v8 = vsel %vm2121_vm7, %v1809_v53, %v1338_v54  ;;  %v1177_v12 = vor.u32 %v1176_v0, %v1173_v62  ;;  %v1180_v13 = vshll.u32 %v1785_v6, 16 }
  0x67   : > { %v971_v38 = vpack.c.b16 %v964_v26, %v963_v25  ;;  %v1166_v11 = vshll.u32 %v1783_v5, 16  ;;  %v1252_v63 = vpack.c.b16 %v1245_v2, %v1244_v1  ;;  %v1368_v10 = vunpack.c.l.b16 %v1335_v7  ;;  %v1788_v25 = vld [vmem:[%s2031_s4 + $0x38] sm:$0xf] }
  0x68   : > { %v1369_v14 = vunpack.c.l.b16 %v1339_v8  ;;  %v965_v15 = vunpack.c.l.b16 %v938_v3  ;;  %v1178_v19 = vrot.slane %v1177_v12, 4  ;;  %v1182_v20 = vrot.slane %v1180_v13, 5  ;;  %v1804_v13 = vld [vmem:[%s2031_s4 + $0x30] sm:$0xe] }
  0x69   : > { %v1185_v40 = vshrl.u32 %v1786_v22, 16  ;;  %v1188_v46 = vshll.u32 %v1786_v22, 16  ;;  %v1202_v39 = vshll.u32 %v1788_v25, 16  ;;  %v1810_v42 = vrot.slane %v1802_v31, 9 }
  0x6a   : > { %v1376_v21 = vpack.c.b16 %v1369_v14, %v1368_v10  ;;  %v1183_v33 = vsel %vm2067_vm4, %v1178_v19, %v1182_v20  ;;  %v1811_v45 = vrot.slane %v1803_v34, 9  ;;  %v1738_v49 = vrot.slane %v1730_v36, 9  ;;  %v1805_v10 = vld [vmem:[%s2031_s4 + $0x38] sm:$0xe] }
  0x6b   : > { %1702 = vmatmul.msk.bf16.gmra.mxu3 %vm385_vm3, %v1695_v29  ;;  %v850_v29 = vpack.c.b16 %v846_v18, %v845_v17  ;;  %v1168_v18 = vrot.slane %v1166_v11, 5  ;;  %v1247_v44 = vunpack.c.l.b16 %v1183_v33  ;;  %v945_v50 = vrot.slane %v2198_v48, 5 }
  0x6c   : > { %v1739_v51 = vrot.slane %v1731_v37, 9  ;;  %v949_v52 = vrot.slane %v2203_v24, 5  ;;  %v1187_v53 = vrot.slane %v1185_v40, 4  ;;  %v1190_v54 = vrot.slane %v1188_v46, 5 }
  0x6d   : > { %v1204_v56 = vrot.slane %v1202_v39, 5  ;;  %v946_v48 = vsel %vm2121_vm7, %v1738_v49, %v945_v50  ;;  %v1194_v1 = vshll.u32 %v1787_v57, 16  ;;  %v1812_v19 = vrot.slane %v1804_v13, 9  ;;  %v1791_v49 = vld [vmem:[%s2031_s4 + $0x44] sm:$0x1] }
  0x6e   : > { %v950_v24 = vsel %vm2121_vm7, %v1739_v51, %v949_v52  ;;  %v1191_v0 = vor.u32 %v1190_v54, %v1187_v53  ;;  %v967_v8 = vunpack.c.l.b16 %v946_v48  ;;  %v1350_v20 = vrot.slane %v1787_v57, 5  ;;  %v1793_v50 = vld [vmem:[%s2031_s4 + $0x4c] sm:$0x1] }
  0x6f   : > { %v968_v3 = vunpack.c.l.b16 %v950_v24  ;;  %v953_v40 = vrot.slane %v2224_v30, 5  ;;  %v1236_v57 = vshll.u32 %v1793_v50, 16 }
  0x70   : > { %1724 = vmatmul.msk.bf16.gmra.mxu0 %vm385_vm3, %v849_v43  ;;  %v1157_v43 = vshrl.u32 %v1782_v32, 16 }
  0x71   : > { %1659 = vmatmul.msk.bf16.gmra.mxu1 %vm385_vm3, %v1655_v23  ;;  %v1160_v23 = vshll.u32 %v1782_v32, 16  ;;  %v973_v14 = vpack.c.b16 %v968_v3, %v967_v8  ;;  %v1807_v8 = vld [vmem:[%s2031_s4 + $0x48] sm:$0xe] }
  0x72   : > { %v1159_v59 = vrot.slane %v1157_v43, 4  ;;  %v1342_v43 = vrot.slane %v1783_v5, 5  ;;  %v1208_v5 = vshll.u32 %v1789_v58, 16  ;;  %v1815_v13 = vrot.slane %v1807_v8, 9 }
  0x74   : > { %v1210_v12 = vrot.slane %v1208_v5, 5 }
  0x75   : > { %1673 = vmatmul.msk.bf16.gmra.mxu2 %vm385_vm3, %v569_v61  ;;  %v1162_v61 = vrot.slane %v1160_v23, 5 }
  0x77   : > { %v1163_v9 = vor.u32 %v1162_v61, %v1159_v59  ;;  %v1343_v59 = vsel %vm2121_vm7, %v1810_v42, %v1342_v43  ;;  %v1351_v42 = vsel %vm2121_vm7, %v1812_v19, %v1350_v20 }
  0x78   : > { %v1372_v52 = vunpack.c.l.b16 %v1351_v42 }
  0x79   : > { %v1164_v17 = vrot.slane %v1163_v9, 4  ;;  %v1196_v9 = vrot.slane %v1194_v1, 5 }
  0x7b   : > { %1703 = vmatmul.msk.bf16.gmra.mxu3 %vm385_vm3, %v1699_v16  ;;  %v966_v16 = vunpack.c.l.b16 %v942_v4  ;;  %v1169_v32 = vsel %vm2067_vm4, %v1164_v17, %v1168_v18  ;;  %v1192_v4 = vrot.slane %v1191_v0, 4  ;;  %v1768_v17 = vld [vmem:[%s2031_s4 + $0x30] sm:$0xf]  ;;  %v1836_v18 = vld [vmem:[%s2031_s4 + $0x34] sm:$0xf0]  ;;  %v1238_v0 = vrot.slane %v1236_v57, 5 }
  0x7c   : > { %v1246_v23 = vunpack.c.l.b16 %v1169_v32  ;;  %v1769_v36 = vor.u32 %v1836_v18, %v1768_v17 }
  0x7d   : > { %v972_v26 = vpack.c.b16 %v966_v16, %v965_v15  ;;  %v1790_v15 = vld [vmem:[%s2031_s4 + $0x40] sm:$0xf]  ;;  %v1792_v16 = vld [vmem:[%s2031_s4 + $0x48] sm:$0xf] }
  0x7e   : > { %v1253_v62 = vpack.c.b16 %v1247_v44, %v1246_v23  ;;  %v1213_v31 = vshrl.u32 %v1790_v15, 16  ;;  %v1216_v32 = vshll.u32 %v1790_v15, 16  ;;  %v1227_v33 = vshrl.u32 %v1792_v16, 16 }
  0x7f   : > { %v1230_v34 = vshll.u32 %v1792_v16, 16 }
  0x80   : > { %1725 = vmatmul.msk.bf16.gmra.mxu0 %vm385_vm3, %v850_v29  ;;  %v1835_v29 = vld [vmem:[%s2031_s4 + $0x24] sm:$0xf0]  ;;  %v1215_v23 = vrot.slane %v1213_v31, 4  ;;  %v1218_v44 = vrot.slane %v1216_v32, 5 }
  0x81   : > { %1744 = vmatmul.msk.bf16.vlgmr.msra.gmra.mxu1 %vm385_vm3, %v971_v38  ;;  %v1199_v38 = vshrl.u32 %v1788_v25, 16  ;;  %v1765_v41 = vor.u32 %v1835_v29, %v1764_v28  ;;  %v1813_v25 = vrot.slane %v1805_v10, 9  ;;  %v1732_v28 = vld [vmem:[%s2031_s4 + $0x38] sm:$0xe]  ;;  %v1733_v29 = vld [vmem:[%s2031_s4 + $0x40] sm:$0xe] }
  0x82   : > { %v1740_v37 = vrot.slane %v1732_v28, 9  ;;  %v1741_v46 = vrot.slane %v1733_v29, 9  ;;  %v1219_v54 = vor.u32 %v1218_v44, %v1215_v23 }
  0x83   : > { %v1201_v55 = vrot.slane %v1199_v38, 4  ;;  %v957_v38 = vrot.slane %v2227_v35, 5 }
  0x84   : > { %v954_v30 = vsel %vm2121_vm7, %v1740_v37, %v953_v40 }
  0x85   : > { %1774 = vmatmul.msk.bf16.vlgmr.msra.gmra.mxu2 %vm385_vm3, %v1761_v47  ;;  %v1346_v47 = vrot.slane %v1785_v6, 5  ;;  %v1205_v2 = vor.u32 %v1204_v56, %v1201_v55  ;;  %v1370_v6 = vunpack.c.l.b16 %v1343_v59  ;;  %v958_v35 = vsel %vm2121_vm7, %v1741_v46, %v957_v38 }
  0x86   : > { %v1222_v55 = vshll.u32 %v1791_v49, 16  ;;  %v970_v59 = vunpack.c.l.b16 %v958_v35 }
  0x87   : > { %v1347_v61 = vsel %vm2121_vm7, %v1811_v45, %v1346_v47  ;;  %v1206_v11 = vrot.slane %v1205_v2, 4  ;;  %v1229_v45 = vrot.slane %v1227_v33, 4  ;;  %v1232_v47 = vrot.slane %v1230_v34, 5  ;;  %v1806_v2 = vld [vmem:[%s2031_s4 + $0x40] sm:$0xe] }
  0x88   : > { %v1371_v7 = vunpack.c.l.b16 %v1347_v61  ;;  %v1224_v48 = vrot.slane %v1222_v55, 5 }
  0x89   : > { %v1211_v22 = vsel %vm2067_vm4, %v1206_v11, %v1210_v12  ;;  %v1233_v56 = vor.u32 %v1232_v47, %v1229_v45  ;;  %v1358_v12 = vrot.slane %v1791_v49, 5 }
  0x8b   : > { %1796 = vmatmul.msk.bf16.vlgmr.msra.gmra.mxu3 %vm385_vm3, %v1252_v63  ;;  %v1377_v63 = vpack.c.b16 %v1371_v7, %v1370_v6  ;;  %v1234_v24 = vrot.slane %v1233_v56, 4  ;;  %v1772_v6 = vld [vmem:[%s2031_s4 + $0x40] sm:$0xf]  ;;  %v1837_v7 = vld [vmem:[%s2031_s4 + $0x44] sm:$0xf0] }
  0x8c   : > { %v1773_v11 = vor.u32 %v1837_v7, %v1772_v6 }
  0x90   : > { %1818 = vmatmul.msk.bf16.vlgmr.msra.gmra.mxu0 %vm385_vm3, %v1376_v21  ;;  %v1197_v21 = vsel %vm2067_vm4, %v1192_v4, %v1196_v9  ;;  %v1239_v4 = vsel %vm2067_vm4, %v1234_v24, %v1238_v0  ;;  %v1814_v9 = vrot.slane %v1806_v2, 9 }
  0x91   : > { %1745 = vmatmul.msk.bf16.gmra.mxu1 %vm385_vm3, %v972_v26  ;;  %v1354_v26 = vrot.slane %v1789_v58, 5  ;;  %v1248_v39 = vunpack.c.l.b16 %v1197_v21  ;;  %v969_v58 = vunpack.c.l.b16 %v954_v30 }
  0x92   : > { %v1359_v15 = vsel %vm2121_vm7, %v1814_v9, %v1358_v12 }
  0x93   : > { %v1355_v43 = vsel %vm2121_vm7, %v1813_v25, %v1354_v26  ;;  %v974_v1 = vpack.c.b16 %v970_v59, %v969_v58  ;;  %v1374_v18 = vunpack.c.l.b16 %v1359_v15 }
  0x94   : > { %v1373_v53 = vunpack.c.l.b16 %v1355_v43 }
  0x95   : > { %1775 = vmatmul.msk.bf16.gmra.mxu2 %vm385_vm3, %v1765_v41  ;;  %v1249_v41 = vunpack.c.l.b16 %v1211_v22 }
  0x96   : > { %v1378_v61 = vpack.c.b16 %v1373_v53, %v1372_v52 }
  0x97   : > { %v1254_v51 = vpack.c.b16 %v1249_v41, %v1248_v39 }
  0x9b   : > { %1797 = vmatmul.msk.bf16.gmra.mxu3 %vm385_vm3, %v1253_v62  ;;  %v1220_v62 = vrot.slane %v1219_v54, 4 }
  0x9d   : > { %v1225_v3 = vsel %vm2067_vm4, %v1220_v62, %v1224_v48 }
  0x9e   : > { %v1250_v10 = vunpack.c.l.b16 %v1225_v3 }
  0xa0   : > { %1819 = vmatmul.msk.bf16.gmra.mxu0 %vm385_vm3, %v1377_v63  ;;  %v1362_v63 = vrot.slane %v1793_v50, 5 }
  0xa1   : > { %1746 = vmatmul.msk.bf16.gmra.mxu1 %vm385_vm3, %v973_v14  ;;  %v1251_v14 = vunpack.c.l.b16 %v1239_v4 }
  0xa2   : > { %v1363_v16 = vsel %vm2121_vm7, %v1815_v13, %v1362_v63 }
  0xa3   : > { %v1255_v27 = vpack.c.b16 %v1251_v14, %v1250_v10  ;;  %v1375_v19 = vunpack.c.l.b16 %v1363_v16  ;;  %v1432_v16 = vld [vmem:[#allocation2 + $0x30] sm:$0xff] }
  0xa5   : > { %1776 = vmatmul.msk.bf16.gmra.mxu2 %vm385_vm3, %v1769_v36  ;;  %v1379_v21 = vpack.c.b16 %v1375_v19, %v1374_v18 }
  0xab   : > { %1798 = vmatmul.msk.bf16.gmra.mxu3 %vm385_vm3, %v1254_v51 }
  0xae   : > { %v2345_v5 = vpop.f32.mrf.mxu1 }
  0xb0   : > { %1820 = vmatmul.msk.bf16.gmra.mxu0 %vm385_vm3, %v1378_v61 }
  0xb1   : > { %1747 = vmatmul.msk.bf16.gmra.mxu1 %vm385_vm3, %v974_v1 }
  0xb5   : > { %1777 = vmatmul.msk.bf16.gmra.mxu2 %vm385_vm3, %v1773_v11 }
  0xb6   : > { %v2361_v17 = vpop.f32.mrf.mxu1 }
  0xb8   : > { %v2363_v20 = vpop.f32.mrf.mxu2 }
  0xbb   : > { %1799 = vmatmul.msk.bf16.gmra.mxu3 %vm385_vm3, %v1255_v27 }
  0xbd   : > { %v411_v22 = vpop.f32.mrf.mxu0 }
  0xbe   : > { %v2366_v25 = vpop.f32.mrf.mxu3  ;;  %v475_v26 = vpop.f32.mrf.mxu1 }
  0xbf   : > { %v476_v56 = vadd.f32 %v475_v26, %v411_v22 }
  0xc0   : > { %1821 = vmatmul.msk.bf16.gmra.mxu0 %vm385_vm3, %v1379_v21  ;;  %v2369_v28 = vpop.f32.mrf.mxu2 }
  0xc5   : > { %v413_v60 = vpop.f32.mrf.mxu0 }
  0xc6   : > { %v2371_v29 = vpop.f32.mrf.mxu3  ;;  %v477_v31 = vpop.f32.mrf.mxu1 }
  0xc7   : > { %v478_v24 = vadd.f32 %v477_v31, %v413_v60 }
  0xc8   : > { %v594_v32 = vpop.f32.mrf.mxu2 }
  0xc9   : > { %v614_v61 = vadd.f32 %v594_v32, %v476_v56 }
  0xcd   : > { %v875_v33 = vpop.f32.mrf.mxu0 }
  0xce   : > { %v679_v34 = vpop.f32.mrf.mxu3  ;;  %v480_v36 = vpop.f32.mrf.mxu1 }
  0xcf   : > { %v699_v48 = vadd.f32 %v679_v34, %v614_v61  ;;  %v481_v11 = vadd.f32 %v480_v36, %v2345_v5 }
  0xd0   : > { %v596_v37 = vpop.f32.mrf.mxu2 }
  0xd1   : > { %v615_v6 = vadd.f32 %v596_v37, %v478_v24  ;;  %v895_v7 = vadd.f32 %v875_v33, %v699_v48  ;;  %v1433_v37 = vld [vmem:[#allocation2] sm:$0xff] }
  0xd5   : > { %v877_v40 = vpop.f32.mrf.mxu0 }
  0xd6   : > { %v681_v46 = vpop.f32.mrf.mxu3  ;;  %v482_v38 = vpop.f32.mrf.mxu1 }
  0xd7   : > { %v700_v4 = vadd.f32 %v681_v46, %v615_v6  ;;  %v483_v60 = vadd.f32 %v482_v38, %v2361_v17 }
  0xd8   : > { %v599_v39 = vpop.f32.mrf.mxu2 }
  0xd9   : > { %v616_v10 = vadd.f32 %v599_v39, %v481_v11  ;;  %v896_v15 = vadd.f32 %v877_v40, %v700_v4 }
  0xdd   : > { %v880_v41 = vpop.f32.mrf.mxu0 }
  0xde   : > { %v684_v42 = vpop.f32.mrf.mxu3  ;;  %v485_v43 = vpop.f32.mrf.mxu1 }
  0xdf   : > { %v701_v21 = vadd.f32 %v684_v42, %v616_v10  ;;  %v486_v42 = vadd.f32 %v485_v43, %v2363_v20 }
  0xe0   : > { %v601_v23 = vpop.f32.mrf.mxu2 }
  0xe1   : > { %v617_v5 = vadd.f32 %v601_v23, %v483_v60  ;;  %v897_v36 = vadd.f32 %v880_v41, %v701_v21  ;;  %v1434_v23 = vld [vmem:[#allocation2 + $0x18] sm:$0xff] }
  0xe5   : > { %v2373_v44 = vpop.f32.mrf.mxu0 }
  0xe6   : > { %v686_v45 = vpop.f32.mrf.mxu3  ;;  %v2375_v47 = vpop.f32.mrf.mxu1 }
  0xe7   : > { %v702_v56 = vadd.f32 %v686_v45, %v617_v5 }
  0xe8   : > { %v604_v49 = vpop.f32.mrf.mxu2 }
  0xe9   : > { %v618_v17 = vadd.f32 %v604_v49, %v486_v42  ;;  %v1438_v42 = vld [vmem:[#allocation2 + $0x28] sm:$0xff] }
  0xed   : > { %v2377_v50 = vpop.f32.mrf.mxu0 }
  0xee   : > { %v2379_v30 = vpop.f32.mrf.mxu3  ;;  %v2381_v35 = vpop.f32.mrf.mxu1 }
  0xf0   : > { %v2383_v51 = vpop.f32.mrf.mxu2 }
  0xf5   : > { %v2385_v52 = vpop.f32.mrf.mxu0 }
  0xf6   : > { %v2387_v53 = vpop.f32.mrf.mxu3  ;;  %v2389_v54 = vpop.f32.mrf.mxu1 }
  0xf8   : > { %v2391_v55 = vpop.f32.mrf.mxu2 }
  0xfd   : > { %v2393_v57 = vpop.f32.mrf.mxu0 }
  0xfe   : > { %v2395_v58 = vpop.f32.mrf.mxu3  ;;  %v999_v59 = vpop.f32.mrf.mxu1 }
  0xff   : > { %v1019_v3 = vadd.f32 %v999_v59, %v895_v7 }
 0x100   : > { %v2397_v62 = vpop.f32.mrf.mxu2 }
 0x105   : > { %v2399_v0 = vpop.f32.mrf.mxu0 }
 0x106   : > { %v2401_v1 = vpop.f32.mrf.mxu3  ;;  %v1001_v2 = vpop.f32.mrf.mxu1 }
 0x107   : > { %v1020_v19 = vadd.f32 %v1001_v2, %v896_v15  ;;  %v898_v2 = vadd.f32 %v2373_v44, %v702_v56 }
 0x108   : > { %v1084_v8 = vpop.f32.mrf.mxu2 }
 0x109   : > { %v1104_v9 = vadd.f32 %v1084_v8, %v1019_v3  ;;  %v703_v3 = vadd.f32 %v2379_v30, %v618_v17 }
 0x10b   : > { %v899_v44 = vadd.f32 %v2377_v50, %v703_v3 }
 0x10d   : > { %v1404_v12 = vpop.f32.mrf.mxu0 }
 0x10e   : > { %v1280_v13 = vpop.f32.mrf.mxu3  ;;  %v1004_v63 = vpop.f32.mrf.mxu1 }
 0x10f   : > { %v1300_v14 = vadd.f32 %v1280_v13, %v1104_v9  ;;  %v1021_v40 = vadd.f32 %v1004_v63, %v897_v36  ;;  %v488_v9 = vadd.f32 %v2375_v47, %v2369_v28  ;;  %v491_v28 = vadd.f32 %v2381_v35, %v2366_v25 }
 0x110   : > { %v1086_v27 = vpop.f32.mrf.mxu2  ;;  %v493_v25 = vadd.f32 %v2389_v54, %v2371_v29 }
 0x111   : > { %v1424_v18 = vadd.f32 %v1404_v12, %v1300_v14  ;;  %v1105_v26 = vadd.f32 %v1086_v27, %v1020_v19  ;;  %v619_v49 = vadd.f32 %v2383_v51, %v488_v9  ;;  %v1435_v12 = vld [vmem:[#allocation2 + $0x10] sm:$0xff]  ;;  %v620_v51 = vadd.f32 %v2391_v55, %v491_v28  ;;  %v1436_v19 = vld [vmem:[#allocation2 + $0x8] sm:$0xff] }
 0x112   : > { %v621_v55 = vadd.f32 %v2397_v62, %v493_v25 }
 0x113   : > { %v1440_v22 = vadd.f32 %v1432_v16, %v1424_v18  ;;  %v704_v30 = vadd.f32 %v2387_v53, %v619_v49  ;;  %v705_v60 = vadd.f32 %v2395_v58, %v620_v51 }
 0x114   : > { %v706_v58 = vadd.f32 %v2401_v1, %v621_v55  ;;  %v1439_v1 = vld [vmem:[#allocation2 + $0x38] sm:$0xff] }
 0x115   : > { %1448 = vst [vmem:[#allocation2 + $0x30] sm:$0xff] %v1440_v22  ;;  %v1406_v31 = vpop.f32.mrf.mxu0  ;;  %v900_v50 = vadd.f32 %v2385_v52, %v704_v30  ;;  %v901_v52 = vadd.f32 %v2393_v57, %v705_v60 }
 0x116   : > { %v1282_v32 = vpop.f32.mrf.mxu3  ;;  %v1006_v33 = vpop.f32.mrf.mxu1 }
 0x117   : > { %v1301_v34 = vadd.f32 %v1282_v32, %v1105_v26  ;;  %v1022_v8 = vadd.f32 %v1006_v33, %v898_v2 }
 0x118   : > { %v1089_v46 = vpop.f32.mrf.mxu2 }
 0x119   : > { %v1425_v39 = vadd.f32 %v1406_v31, %v1301_v34  ;;  %v1106_v61 = vadd.f32 %v1089_v46, %v1021_v40  ;;  %v1437_v34 = vld [vmem:[#allocation2 + $0x20] sm:$0xff] }
 0x11b   : > { %v1441_v59 = vadd.f32 %v1433_v37, %v1425_v39 }
 0x11d   : > { %1449 = vst [vmem:[#allocation2] sm:$0xff] %v1441_v59  ;;  %v1409_v48 = vpop.f32.mrf.mxu0 }
 0x11e   : > { %v1285_v24 = vpop.f32.mrf.mxu3  ;;  %v1009_v6 = vpop.f32.mrf.mxu1 }
 0x11f   : > { %v1302_v38 = vadd.f32 %v1285_v24, %v1106_v61  ;;  %v1023_v10 = vadd.f32 %v1009_v6, %v899_v44  ;;  %v902_v61 = vadd.f32 %v2399_v0, %v706_v58 }
 0x120   : > { %v1091_v7 = vpop.f32.mrf.mxu2 }
 0x121   : > { %v1426_v41 = vadd.f32 %v1409_v48, %v1302_v38  ;;  %v1107_v45 = vadd.f32 %v1091_v7, %v1022_v8 }
 0x123   : > { %v1442_v4 = vadd.f32 %v1434_v23, %v1426_v41 }
 0x125   : > { %1450 = vst [vmem:[#allocation2 + $0x18] sm:$0xff] %v1442_v4  ;;  %v1411_v20 = vpop.f32.mrf.mxu0 }
 0x126   : > { %v1287_v43 = vpop.f32.mrf.mxu3  ;;  %v1011_v14 = vpop.f32.mrf.mxu1 }
 0x127   : > { %v1303_v11 = vadd.f32 %v1287_v43, %v1107_v45  ;;  %v1024_v26 = vadd.f32 %v1011_v14, %v900_v50 }
 0x128   : > { %v1094_v13 = vpop.f32.mrf.mxu2 }
 0x129   : > { %v1427_v63 = vadd.f32 %v1411_v20, %v1303_v11  ;;  %v1108_v16 = vadd.f32 %v1094_v13, %v1023_v10 }
 0x12b   : > { %v1443_v15 = vadd.f32 %v1435_v12, %v1427_v63 }
 0x12d   : > { %1451 = vst [vmem:[#allocation2 + $0x10] sm:$0xff] %v1443_v15  ;;  %v1414_v47 = vpop.f32.mrf.mxu0 }
 0x12e   : > { %v1290_v27 = vpop.f32.mrf.mxu3  ;;  %v1014_v32 = vpop.f32.mrf.mxu1 }
 0x12f   : > { %v1304_v18 = vadd.f32 %v1290_v27, %v1108_v16  ;;  %v1025_v46 = vadd.f32 %v1014_v32, %v901_v52 }
 0x130   : > { %v1096_v21 = vpop.f32.mrf.mxu2 }
 0x131   : > { %v1428_v22 = vadd.f32 %v1414_v47, %v1304_v18  ;;  %v1109_v31 = vadd.f32 %v1096_v21, %v1024_v26 }
 0x133   : > { %v1444_v53 = vadd.f32 %v1436_v19, %v1428_v22 }
 0x135   : > { %1452 = vst [vmem:[#allocation2 + $0x8] sm:$0xff] %v1444_v53  ;;  %v1416_v35 = vpop.f32.mrf.mxu0 }
 0x136   : > { %v1292_v33 = vpop.f32.mrf.mxu3  ;;  %v1016_v56 = vpop.f32.mrf.mxu1 }
 0x137   : > { %v1305_v5 = vadd.f32 %v1292_v33, %v1109_v31  ;;  %v1026_v24 = vadd.f32 %v1016_v56, %v902_v61 }
 0x138   : > { %v1099_v36 = vpop.f32.mrf.mxu2 }
 0x139   : > { %v1429_v37 = vadd.f32 %v1416_v35, %v1305_v5  ;;  %v1110_v40 = vadd.f32 %v1099_v36, %v1025_v46 }
 0x13b   : > { %v1445_v39 = vadd.f32 %v1437_v34, %v1429_v37 }
 0x13d   : > { %1453 = vst [vmem:[#allocation2 + $0x20] sm:$0xff] %v1445_v39  ;;  %v1419_v59 = vpop.f32.mrf.mxu0 }
 0x13e   : > { %v1295_v29 = vpop.f32.mrf.mxu3 }
 0x13f   : > { %v1306_v54 = vadd.f32 %v1295_v29, %v1110_v40 }
 0x140   : > { %v1101_v62 = vpop.f32.mrf.mxu2 }
 0x141   : > { %v1430_v48 = vadd.f32 %v1419_v59, %v1306_v54  ;;  %v1111_v17 = vadd.f32 %v1101_v62, %v1026_v24 }
 0x143   : > { %v1446_v57 = vadd.f32 %v1438_v42, %v1430_v48 }
 0x145   : > { %1454 = vst [vmem:[#allocation2 + $0x28] sm:$0xff] %v1446_v57  ;;  %v1421_v6 = vpop.f32.mrf.mxu0 }
 0x146   : > { %v1297_v38 = vpop.f32.mrf.mxu3 }
 0x147   : > { %v1307_v2 = vadd.f32 %v1297_v38, %v1111_v17 }
 0x149   : > { %v1431_v23 = vadd.f32 %v1421_v6, %v1307_v2  ;;  %1459 = sbr.rel (%p1822_p10) target bundleno = 345 (0x159), region = 40 }
 0x14b   : > { %v1447_v7 = vadd.f32 %v1439_v1, %v1431_v23 }
 0x14d   : > { %1455 = vst [vmem:[#allocation2 + $0x38] sm:$0xff] %v1447_v7 }
 0x14e   : > { %v1460_v41 = vld [vmem:[#allocation2 + $0x30] sm:$0xff]  ;;  %v1900_v0 = vld [vmem:[%s2459_s2] ss:$0 sm:$0xff]  ;;  %v1462_v3 = vld [vmem:[#allocation2 + $0x18] sm:$0xff] }
 0x14f   : > { %v1461_v8 = vld [vmem:[#allocation2] sm:$0xff]  ;;  %v1463_v4 = vld [vmem:[#allocation2 + $0x10] sm:$0xff]  ;;  %v1472_v45 = vadd.f32 %v1900_v0, %v1460_v41  ;;  %v1474_v20 = vadd.f32 %v1900_v0, %v1462_v3  ;;  %v1464_v43 = vld [vmem:[#allocation2 + $0x8] sm:$0xff] }
 0x150   : > { %v1473_v9 = vadd.f32 %v1900_v0, %v1461_v8  ;;  %v1465_v49 = vld [vmem:[#allocation2 + $0x20] sm:$0xff]  ;;  %v1475_v11 = vadd.f32 %v1900_v0, %v1463_v4  ;;  %v1466_v44 = vld [vmem:[#allocation2 + $0x28] sm:$0xff]  ;;  %v1476_v12 = vadd.f32 %v1900_v0, %v1464_v43 }
 0x151   : > { %1480 = vst [vmem:[%s2036_s9] sm:$0xff] %v1472_v45  ;;  %v1477_v63 = vadd.f32 %v1900_v0, %v1465_v49  ;;  %v1478_v10 = vadd.f32 %v1900_v0, %v1466_v44 }
 0x152   : > { %1481 = vst [vmem:[%s2036_s9 + $0x8] sm:$0xff] %v1473_v9 }
 0x153   : > { %1482 = vst [vmem:[%s2036_s9 + $0x10] sm:$0xff] %v1474_v20 }
 0x154   : > { %v1467_v13 = vld [vmem:[#allocation2 + $0x38] sm:$0xff]  ;;  %1483 = vst [vmem:[%s2036_s9 + $0x18] sm:$0xff] %v1475_v11 }
 0x155   : > { %v1479_v14 = vadd.f32 %v1900_v0, %v1467_v13  ;;  %1484 = vst [vmem:[%s2036_s9 + $0x20] sm:$0xff] %v1476_v12 }
 0x156   : > { %1485 = vst [vmem:[%s2036_s9 + $0x28] sm:$0xff] %v1477_v63 }
 0x157   : > { %1486 = vst [vmem:[%s2036_s9 + $0x30] sm:$0xff] %v1478_v10 }
 0x158   : > { %1487 = vst [vmem:[%s2036_s9 + $0x38] sm:$0xff] %v1479_v14 }
 0x159 PF: > { %s13_s18 = sadd.s32 1, %s1955_s18   ;;  %s2465_s12 = smov %s1943_s15 }
 0x15a   : > { %p10_p11 = scmp.ge.s32.totalorder %s13_s18, 50   ;;  %s2466_s13 = smov %s1947_s16 }
 0x15b   : > { %s2467_s14 = smov %s1951_s17  ;;  %s2468_s15 = smov %s2472_s19 }
 0x15c   : > { %s2469_s16 = smov %s2476_s20  ;;  %s2470_s17 = smov %s2480_s21 }
 0x15d   :  { %12 = sbr.rel (!%p10_p11) target bundleno = 4 (0x4), region = 81 }

</bundles_post_ra>
